<compile_context>
chip_gen: v7x
topology: tpu7x:2x2x1
jax: 0.10.0
libtpu: 0.0.40
codegen_flags: <defaults>
</compile_context>

<pallas_src>
import jax
import jax.numpy as jnp
from jax.experimental import pallas as pl
from jax.experimental.pallas import tpu as pltpu

_NEG_SLOPE = 0.01  # PyTorch nn.LeakyReLU default


def _decoderp_kernel(z_ref, w1_ref, b1_ref, w2_ref, b2_ref, w3_ref, b3_ref,
                     out_ref):
    # fc1: Linear + LeakyReLU   (Dropout in eval mode -> identity)
    h = jnp.dot(z_ref[...].astype(jnp.bfloat16), w1_ref[...],
                preferred_element_type=jnp.float32) + b1_ref[...]
    h = jnp.where(h > 0, h, _NEG_SLOPE * h)

    # fc2: Linear + LeakyReLU   (Dropout in eval mode -> identity)
    h = jnp.dot(h.astype(jnp.bfloat16), w2_ref[...],
                preferred_element_type=jnp.float32) + b2_ref[...]
    h = jnp.where(h > 0, h, _NEG_SLOPE * h)

    # fc3: Linear + ReLU
    h = jnp.dot(h.astype(jnp.bfloat16), w3_ref[...],
                preferred_element_type=jnp.float32) + b3_ref[...]
    out_ref[...] = jnp.maximum(h, 0.0).astype(out_ref.dtype)


def _round_up(n, m):
    return ((n + m - 1) // m) * m


def _pad2d(x, rows, cols):
    return jnp.pad(x, ((0, rows - x.shape[0]), (0, cols - x.shape[1])))


def prepare_params(params):
    """One-time param prep: lane-pad feature dims and cast weights to bf16.

    Call once per model; the returned dict is reused across every forward call
    so the pad+cast HBM traffic is not paid per inference.
    Weights are stored [in, out] (transposed vs nn.Linear.weight).
    """
    w1, b1 = params["w1"], params["b1"]
    w2, b2 = params["w2"], params["b2"]
    w3, b3 = params["w3"], params["b3"]
    z_dim, hidden = w1.shape
    out_dim = w3.shape[1]

    zin_p = _round_up(z_dim, 128)    # 32  -> 128 (lane-dense z DMA / full MXU K)
    hid_p = _round_up(hidden, 128)   # 800 -> 896
    out_p = _round_up(out_dim, 128)  # 64  -> 128

    prepped = dict(
        z_dim=z_dim, zin_p=zin_p, hid_p=hid_p, out_dim=out_dim, out_p=out_p,
        w1=_pad2d(w1, zin_p, hid_p).astype(jnp.bfloat16),
        b1=_pad2d(b1, 1, hid_p).astype(jnp.float32),
        w2=_pad2d(w2, hid_p, hid_p).astype(jnp.bfloat16),
        b2=_pad2d(b2, 1, hid_p).astype(jnp.float32),
        w3=_pad2d(w3, hid_p, out_p).astype(jnp.bfloat16),
        b3=_pad2d(b3, 1, out_p).astype(jnp.float32),
    )
    # Materialize once so the pad/cast is not re-traced into every caller.
    return jax.tree_util.tree_map(
        lambda x: jax.block_until_ready(x) if isinstance(x, jax.Array) else x,
        prepped)


def _pick_batch_tile(B, max_batch_tile):
    """Adaptive batch tile: multiple of 16 (bf16 sublane packing), capped at
    max_batch_tile, chosen so batch-padding waste stays < one 16-row group."""
    n_steps = max(1, -(-B // max_batch_tile))        # cdiv
    tb = _round_up(-(-B // n_steps), 16)             # cdiv then round to 16
    return min(tb, _round_up(max_batch_tile, 16))


def decoderp_forward(z, prepped, *, max_batch_tile=512, out_dtype=jnp.float32):
    """z: [B, z_dim] float32. prepped: output of prepare_params()."""
    B, z_dim = z.shape
    assert z_dim == prepped["z_dim"]
    zin_p, hid_p, out_p = prepped["zin_p"], prepped["hid_p"], prepped["out_p"]
    out_dim = prepped["out_dim"]

    tb = _pick_batch_tile(B, max_batch_tile)
    b_pad = _round_up(B, tb)
    grid_steps = b_pad // tb

    # Per-call padding is only on z (cheap); weights are already prepped.
    zp = _pad2d(z.astype(jnp.float32), b_pad, zin_p)

    const = lambda i: (0, 0)  # weights/biases resident in VMEM, DMA'd once

    # Megacore gate: only split the batch axis across TensorCores when there
    # is enough work per core to amortize each core's own resident-weight DMA.
    semantics = ("parallel",) if grid_steps >= 4 else ("arbitrary",)

    out = pl.pallas_call(
        _decoderp_kernel,
        out_shape=jax.ShapeDtypeStruct((b_pad, out_p), out_dtype),
        grid=(grid_steps,),
        in_specs=[
            pl.BlockSpec((tb, zin_p), lambda i: (i, 0)),   # z: tiled over batch
            pl.BlockSpec((zin_p, hid_p), const),           # w1
            pl.BlockSpec((1, hid_p), const),               # b1
            pl.BlockSpec((hid_p, hid_p), const),           # w2
            pl.BlockSpec((1, hid_p), const),               # b2
            pl.BlockSpec((hid_p, out_p), const),           # w3
            pl.BlockSpec((1, out_p), const),               # b3
        ],
        out_specs=pl.BlockSpec((tb, out_p), lambda i: (i, 0)),
        compiler_params=pltpu.CompilerParams(
            dimension_semantics=semantics),
    )(zp, prepped["w1"], prepped["b1"], prepped["w2"], prepped["b2"],
      prepped["w3"], prepped["b3"])

    return out[:B, :out_dim]


def init_params(key, z_dim, output_dim, hidden=800):
    """Deterministic synthetic init (uniform +-1/sqrt(fan_in), like nn.Linear)."""
    ks = jax.random.split(key, 6)

    def lin(kw, kb, fan_in, fan_out):
        bound = 1.0 / jnp.sqrt(fan_in)
        w = jax.random.uniform(kw, (fan_in, fan_out), jnp.float32, -bound, bound)
        b = jax.random.uniform(kb, (1, fan_out), jnp.float32, -bound, bound)
        return w, b

    w1, b1 = lin(ks[0], ks[1], z_dim, hidden)
    w2, b2 = lin(ks[2], ks[3], hidden, hidden)
    w3, b3 = lin(ks[4], ks[5], hidden, output_dim)
    return dict(w1=w1, b1=b1, w2=w2, b2=b2, w3=w3, b3=b3)


def _reference(z, p):
    """Pure-JAX reference mirroring the kernel math (bf16 operands, f32 accum)."""
    def dot(x, w):
        return jnp.dot(x.astype(jnp.bfloat16), w.astype(jnp.bfloat16),
                       preferred_element_type=jnp.float32)
    h = dot(z, p["w1"]) + p["b1"]
    h = jnp.where(h > 0, h, _NEG_SLOPE * h)
    h = dot(h, p["w2"]) + p["b2"]
    h = jnp.where(h > 0, h, _NEG_SLOPE * h)
    h = dot(h, p["w3"]) + p["b3"]
    return jnp.maximum(h, 0.0)


if __name__ == "__main__":
    key = jax.random.PRNGKey(0)
    k_z, k_p = jax.random.split(key)

    B, z_dim, output_dim = 8, 32, 64
    z = jax.random.normal(k_z, (B, z_dim), dtype=jnp.float32)
    params = init_params(k_p, z_dim, output_dim)

    prepped = prepare_params(params)          # one-time weight pad + bf16 cast
    out = decoderp_forward(z, prepped)
    out = jax.block_until_ready(out)

    ref = _reference(z, params)
    assert out.shape == (B, output_dim)
    # bf16 operands over K=896 -> relative error up to ~1e-2; tolerance sized
    # so the bf16-matched reference check does not flake.
    assert jnp.allclose(out, ref, atol=1e-2, rtol=1e-2), "mismatch vs reference"

    print("KERNEL_OK")
</pallas_src>

<mosaic_0001>
module attributes {stable_mosaic.version = 11 : i64} {
  func.func @_decoderp_kernel(%arg0: i32, %arg1: memref<16x128xf32, #tpu.memory_space<vmem>>, %arg2: memref<128x896xbf16, #tpu.memory_space<vmem>>, %arg3: memref<1x896xf32, #tpu.memory_space<vmem>>, %arg4: memref<896x896xbf16, #tpu.memory_space<vmem>>, %arg5: memref<1x896xf32, #tpu.memory_space<vmem>>, %arg6: memref<896x128xbf16, #tpu.memory_space<vmem>>, %arg7: memref<1x128xf32, #tpu.memory_space<vmem>>, %arg8: memref<16x128xf32, #tpu.memory_space<vmem>>) attributes {dimension_semantics = [#tpu.dimension_semantics<arbitrary>], iteration_bounds = array<i64: 1>, scalar_prefetch = 0 : i64, scratch_operands = 0 : i64, tpu.core_type = #tpu.core_type<tc>, window_params = [{transform_indices = @transform_0, window_bounds = array<i64: 16, 128>}, {pipeline_mode = #tpu.pipeline_mode<synchronous>, transform_indices = @transform_1, window_bounds = array<i64: 128, 896>}, {pipeline_mode = #tpu.pipeline_mode<synchronous>, transform_indices = @transform_2, window_bounds = array<i64: 1, 896>}, {pipeline_mode = #tpu.pipeline_mode<synchronous>, transform_indices = @transform_3, window_bounds = array<i64: 896, 896>}, {pipeline_mode = #tpu.pipeline_mode<synchronous>, transform_indices = @transform_4, window_bounds = array<i64: 1, 896>}, {pipeline_mode = #tpu.pipeline_mode<synchronous>, transform_indices = @transform_5, window_bounds = array<i64: 896, 128>}, {pipeline_mode = #tpu.pipeline_mode<synchronous>, transform_indices = @transform_6, window_bounds = array<i64: 1, 128>}, {transform_indices = @transform_7, window_bounds = array<i64: 16, 128>}]} {
    %c0 = arith.constant 0 : index
    %c0_0 = arith.constant 0 : index
    %0 = vector.load %arg1[%c0, %c0_0] : memref<16x128xf32, #tpu.memory_space<vmem>>, vector<16x128xf32>
    %1 = arith.truncf %0 : vector<16x128xf32> to vector<16x128xbf16>
    %c0_1 = arith.constant 0 : index
    %c0_2 = arith.constant 0 : index
    %2 = vector.load %arg2[%c0_1, %c0_2] : memref<128x896xbf16, #tpu.memory_space<vmem>>, vector<128x896xbf16>
    %cst = arith.constant dense<0.000000e+00> : vector<16x896xf32>
    %3 = tpu.matmul %1, %2, %cst {dimension_numbers = #tpu.dot_dimension_numbers<[1], [0], [0], [1], [0, 0, 1, 1], [], []>} : vector<16x128xbf16>, vector<128x896xbf16>, vector<16x896xf32> -> vector<16x896xf32>
    %c0_3 = arith.constant 0 : index
    %c0_4 = arith.constant 0 : index
    %4 = vector.load %arg3[%c0_3, %c0_4] : memref<1x896xf32, #tpu.memory_space<vmem>>, vector<1x896xf32>
    %5 = vector.broadcast %4 : vector<1x896xf32> to vector<16x896xf32>
    %6 = arith.addf %3, %5 : vector<16x896xf32>
    %cst_5 = arith.constant 0.000000e+00 : f32
    %7 = vector.broadcast %cst_5 : f32 to vector<16x896xf32>
    %8 = arith.cmpf ogt, %6, %7 : vector<16x896xf32>
    %cst_6 = arith.constant 0.00999999977 : f32
    %9 = vector.broadcast %cst_6 : f32 to vector<16x896xf32>
    %10 = arith.mulf %9, %6 : vector<16x896xf32>
    %11 = arith.select %8, %6, %10 : vector<16x896xi1>, vector<16x896xf32>
    %12 = arith.truncf %11 : vector<16x896xf32> to vector<16x896xbf16>
    %c0_7 = arith.constant 0 : index
    %c0_8 = arith.constant 0 : index
    %13 = vector.load %arg4[%c0_7, %c0_8] : memref<896x896xbf16, #tpu.memory_space<vmem>>, vector<896x896xbf16>
    %cst_9 = arith.constant dense<0.000000e+00> : vector<16x896xf32>
    %14 = tpu.matmul %12, %13, %cst_9 {dimension_numbers = #tpu.dot_dimension_numbers<[1], [0], [0], [1], [0, 0, 1, 1], [], []>} : vector<16x896xbf16>, vector<896x896xbf16>, vector<16x896xf32> -> vector<16x896xf32>
    %c0_10 = arith.constant 0 : index
    %c0_11 = arith.constant 0 : index
    %15 = vector.load %arg5[%c0_10, %c0_11] : memref<1x896xf32, #tpu.memory_space<vmem>>, vector<1x896xf32>
    %16 = vector.broadcast %15 : vector<1x896xf32> to vector<16x896xf32>
    %17 = arith.addf %14, %16 : vector<16x896xf32>
    %cst_12 = arith.constant 0.000000e+00 : f32
    %18 = vector.broadcast %cst_12 : f32 to vector<16x896xf32>
    %19 = arith.cmpf ogt, %17, %18 : vector<16x896xf32>
    %cst_13 = arith.constant 0.00999999977 : f32
    %20 = vector.broadcast %cst_13 : f32 to vector<16x896xf32>
    %21 = arith.mulf %20, %17 : vector<16x896xf32>
    %22 = arith.select %19, %17, %21 : vector<16x896xi1>, vector<16x896xf32>
    %23 = arith.truncf %22 : vector<16x896xf32> to vector<16x896xbf16>
    %c0_14 = arith.constant 0 : index
    %c0_15 = arith.constant 0 : index
    %24 = vector.load %arg6[%c0_14, %c0_15] : memref<896x128xbf16, #tpu.memory_space<vmem>>, vector<896x128xbf16>
    %cst_16 = arith.constant dense<0.000000e+00> : vector<16x128xf32>
    %25 = tpu.matmul %23, %24, %cst_16 {dimension_numbers = #tpu.dot_dimension_numbers<[1], [0], [0], [1], [0, 0, 1, 1], [], []>} : vector<16x896xbf16>, vector<896x128xbf16>, vector<16x128xf32> -> vector<16x128xf32>
    %c0_17 = arith.constant 0 : index
    %c0_18 = arith.constant 0 : index
    %26 = vector.load %arg7[%c0_17, %c0_18] : memref<1x128xf32, #tpu.memory_space<vmem>>, vector<1x128xf32>
    %27 = vector.broadcast %26 : vector<1x128xf32> to vector<16x128xf32>
    %28 = arith.addf %25, %27 : vector<16x128xf32>
    %cst_19 = arith.constant 0.000000e+00 : f32
    %29 = vector.broadcast %cst_19 : f32 to vector<16x128xf32>
    %30 = arith.maximumf %28, %29 : vector<16x128xf32>
    %c0_20 = arith.constant 0 : index
    %c0_21 = arith.constant 0 : index
    %31 = vector.load %arg8[%c0_20, %c0_21] : memref<16x128xf32, #tpu.memory_space<vmem>>, vector<16x128xf32>
    tpu.vector_store %arg8[%c0_20, %c0_21], %30 {strides = array<i32>} : memref<16x128xf32, #tpu.memory_space<vmem>>, vector<16x128xf32>,
    return
  }
  func.func @transform_0(%arg0: i32) -> (i32, i32) {
    %c0_i32 = arith.constant 0 : i32
    %c0_i32_0 = arith.constant 0 : i32
    return %arg0, %c0_i32 : i32, i32
  }
  func.func @transform_1(%arg0: i32) -> (i32, i32) {
    %c0_i32 = arith.constant 0 : i32
    %c0_i32_0 = arith.constant 0 : i32
    %c0_i32_1 = arith.constant 0 : i32
    return %c0_i32, %c0_i32_0 : i32, i32
  }
  func.func @transform_2(%arg0: i32) -> (i32, i32) {
    %c0_i32 = arith.constant 0 : i32
    %c0_i32_0 = arith.constant 0 : i32
    %c0_i32_1 = arith.constant 0 : i32
    return %c0_i32, %c0_i32_0 : i32, i32
  }
  func.func @transform_3(%arg0: i32) -> (i32, i32) {
    %c0_i32 = arith.constant 0 : i32
    %c0_i32_0 = arith.constant 0 : i32
    %c0_i32_1 = arith.constant 0 : i32
    return %c0_i32, %c0_i32_0 : i32, i32
  }
  func.func @transform_4(%arg0: i32) -> (i32, i32) {
    %c0_i32 = arith.constant 0 : i32
    %c0_i32_0 = arith.constant 0 : i32
    %c0_i32_1 = arith.constant 0 : i32
    return %c0_i32, %c0_i32_0 : i32, i32
  }
  func.func @transform_5(%arg0: i32) -> (i32, i32) {
    %c0_i32 = arith.constant 0 : i32
    %c0_i32_0 = arith.constant 0 : i32
    %c0_i32_1 = arith.constant 0 : i32
    return %c0_i32, %c0_i32_0 : i32, i32
  }
  func.func @transform_6(%arg0: i32) -> (i32, i32) {
    %c0_i32 = arith.constant 0 : i32
    %c0_i32_0 = arith.constant 0 : i32
    %c0_i32_1 = arith.constant 0 : i32
    return %c0_i32, %c0_i32_0 : i32, i32
  }
  func.func @transform_7(%arg0: i32) -> (i32, i32) {
    %c0_i32 = arith.constant 0 : i32
    %c0_i32_0 = arith.constant 0 : i32
    return %arg0, %c0_i32 : i32, i32
  }
}

</mosaic_0001>

<bundles_post_ra>
// kernel: tpu_custom_call.1
= control target key start
LH: loop header
LB: loop body
LE: loop exit
PB: predicated region body
PF: predicated region fallthrough
CT: control target
= control target key end

     0   :  { %12 = vsyncpa [#allocation3], 0  ;;  %s6581_s0 = inlined_call_operand.hbm [shape: f32[16,128], index: 0, kind: input, shape index: {}]   ;;  %s6582_s1 = inlined_call_operand.hbm [shape: bf16[128,896], index: 1, kind: input, shape index: {}]   ;;  %s6583_s2 = inlined_call_operand.hbm [shape: f32[1,896], index: 2, kind: input, shape index: {}]   ;;  %s6584_s3 = inlined_call_operand.hbm [shape: bf16[896,896], index: 3, kind: input, shape index: {}]   ;;  %s6585_s4 = inlined_call_operand.hbm [shape: f32[1,896], index: 4, kind: input, shape index: {}]   ;;  %s6586_s5 = inlined_call_operand.hbm [shape: bf16[896,128], index: 5, kind: input, shape index: {}]   ;;  %s6587_s6 = inlined_call_operand.hbm [shape: f32[1,128], index: 6, kind: input, shape index: {}]   ;;  %s6588_s7 = inlined_call_operand.hbm [shape: f32[16,128], index: 7, kind: output, shape index: {}]  }
   0x1   :  { %13 = vsyncpa [#allocation6], 0 }
   0x2   :  { %14 = vsyncpa [#allocation9], 0 }
   0x3   :  { %15 = vsyncpa [#allocation12], 0 }
   0x4   :  { %16 = vsyncpa [#allocation4], 0  ;;  %s6272_s24 = smov [#allocation5]   ;;  %s6086_s28 = scalar_lea.hbm %s6582_s1, 7168 }
   0x5   :  { %s34_s25 = sshll.u32 %s6272_s24, 4  ;;  %p6087_p0 = scmp.ne.s32.totalorder %s6582_s1, %s6086_s28  ;;  %s35_s25 = int_to_ptr.vmem [resolvable:$true] %s34_s25 }
   0x6   :  { %p6090_p1 = scmp.lt.u32.totalorder %s6086_s28, %s6582_s1 }
   0x8   :  { %p6092_p2 = pnand %p6090_p1, %p6087_p0 }
   0xa   :  { %6095 = shalt.err (!%p6092_p2)
}
   0xb   :  { %s6096_s10 = scalar_lea.vmem %s35_s25, 7168  ;;  %p6101_p4 = scmp.lt.s32.totalorder %s35_s25, %s35_s25 }
   0xc   :  { %p6097_p3 = scmp.ne.s32.totalorder %s35_s25, %s6096_s10  ;;  %p6102_p5 = scmp.lt.s32.totalorder %s6096_s10, %s6096_s10 }
   0xe   :  { %p6103_p6 = por %p6102_p5, %p6101_p4 }
  0x10   :  { %p6104_p7 = pnand %p6103_p6, %p6097_p3 }
  0x12   :  { %6107 = shalt.err (!%p6104_p7)
}
  0x13   :  { %s6273_s11 = smov 448   ;;  %s6274_s12 = smov 28  }
  0x14   :  { %40 = dma.hbm_to_vmem [thread:$0]  %s6582_s1, 7168, %s35_s25, [#allocation6], %s6273_s11, %s6273_s11, %s6274_s12  }
  0x15   :  { %s6275_s15 = smov [#allocation8]   ;;  %s6276_s17 = smov [#allocation11]  }
  0x16   :  { %s56_s16 = sshll.u32 %s6275_s15, 4  ;;  %s78_s18 = sshll.u32 %s6276_s17, 4  ;;  %s57_s16 = int_to_ptr.vmem [resolvable:$true] %s56_s16  ;;  %s79_s18 = int_to_ptr.vmem [resolvable:$true] %s78_s18 }
  0x17   :  { %s6108_s21 = scalar_lea.hbm %s6584_s3, 50176 }
  0x18   :  { %p6109_p8 = scmp.ne.s32.totalorder %s6584_s3, %s6108_s21  ;;  %p6112_p9 = scmp.lt.u32.totalorder %s6108_s21, %s6584_s3 }
  0x1a   :  { %p6114_p10 = pnand %p6112_p9, %p6109_p8 }
  0x1c   :  { %6117 = shalt.err (!%p6114_p10)
}
  0x1d   :  { %s6118_s1 = scalar_lea.vmem %s57_s16, 50176  ;;  %p6123_p12 = scmp.lt.s32.totalorder %s57_s16, %s57_s16 }
  0x1e   :  { %p6119_p11 = scmp.ne.s32.totalorder %s57_s16, %s6118_s1  ;;  %p6124_p13 = scmp.lt.s32.totalorder %s6118_s1, %s6118_s1 }
  0x20   :  { %p6125_p0 = por %p6124_p13, %p6123_p12 }
  0x22   :  { %p6126_p1 = pnand %p6125_p0, %p6119_p11 }
  0x24   :  { %6129 = shalt.err (!%p6126_p1)
}
  0x25   :  { %62 = dma.hbm_to_vmem [thread:$0]  %s6584_s3, 50176, %s57_s16, [#allocation9], %s6273_s11, %s6273_s11, %s6274_s12  }
  0x26   :  { %s6130_s30 = scalar_lea.hbm %s6586_s5, 7168 }
  0x27   :  { %p6131_p2 = scmp.ne.s32.totalorder %s6586_s5, %s6130_s30  ;;  %p6134_p3 = scmp.lt.u32.totalorder %s6130_s30, %s6586_s5 }
  0x29   :  { %p6136_p4 = pnand %p6134_p3, %p6131_p2 }
  0x2b   :  { %6139 = shalt.err (!%p6136_p4)
}
  0x2c   :  { %s6140_s14 = scalar_lea.vmem %s79_s18, 7168  ;;  %p6145_p6 = scmp.lt.s32.totalorder %s79_s18, %s79_s18 }
  0x2d   :  { %p6141_p5 = scmp.ne.s32.totalorder %s79_s18, %s6140_s14  ;;  %p6146_p7 = scmp.lt.s32.totalorder %s6140_s14, %s6140_s14 }
  0x2f   :  { %p6147_p8 = por %p6146_p7, %p6145_p6 }
  0x31   :  { %p6148_p9 = pnand %p6147_p8, %p6141_p5 }
  0x33   :  { %6151 = shalt.err (!%p6148_p9)
}
  0x34   :  { %s6277_s3 = smov 64   ;;  %s6278_s11 = smov 4  }
  0x35   :  { %84 = dma.hbm_to_vmem [thread:$0]  %s6586_s5, 7168, %s79_s18, [#allocation12], %s6277_s3, %s6277_s3, %s6278_s11  }
  0x36   :  { %s6279_s16 = smov [#allocation2]   ;;  %s6152_s21 = scalar_lea.hbm %s6581_s0, 256 }
  0x37   :  { %s22_s17 = sshll.u32 %s6279_s16, 4  ;;  %p6153_p10 = scmp.ne.s32.totalorder %s6581_s0, %s6152_s21  ;;  %s23_s17 = int_to_ptr.vmem [resolvable:$true] %s22_s17 }
  0x38   :  { %p6156_p11 = scmp.lt.u32.totalorder %s6152_s21, %s6581_s0 }
  0x3a   :  { %p6158_p12 = pnand %p6156_p11, %p6153_p10 }
  0x3c   :  { %6161 = shalt.err (!%p6158_p12)
}
  0x3d   :  { %s6162_s1 = scalar_lea.vmem %s23_s17, 256  ;;  %p6167_p0 = scmp.lt.s32.totalorder %s23_s17, %s23_s17 }
  0x3e   :  { %p6163_p13 = scmp.ne.s32.totalorder %s23_s17, %s6162_s1  ;;  %p6168_p1 = scmp.lt.s32.totalorder %s6162_s1, %s6162_s1 }
  0x40   :  { %p6169_p2 = por %p6168_p1, %p6167_p0 }
  0x42   :  { %p6170_p3 = pnand %p6169_p2, %p6163_p13 }
  0x44   :  { %6173 = shalt.err (!%p6170_p3)
}
  0x45   :  { %s6280_s5 = smov 128   ;;  %s6281_s18 = smov 8  }
  0x46   :  { %28 = dma.hbm_to_vmem [thread:$0]  %s6581_s0, 256, %s23_s17, [#allocation3], %s6280_s5, %s6280_s5, %s6281_s18  }
  0x47   :  { %s6282_s28 = smov [#allocation7]   ;;  %s6283_s30 = smov [#allocation10]  }
  0x48   :  { %s47_s29 = sshll.u32 %s6282_s28, 4  ;;  %s69_s8 = sshll.u32 %s6283_s30, 4  ;;  %s48_s29 = int_to_ptr.vmem [resolvable:$true] %s47_s29  ;;  %s70_s8 = int_to_ptr.vmem [resolvable:$true] %s69_s8 }
  0x49   :  { %s6174_s13 = scalar_lea.hbm %s6583_s2, 112 }
  0x4a   :  { %p6175_p4 = scmp.ne.s32.totalorder %s6583_s2, %s6174_s13  ;;  %p6178_p5 = scmp.lt.u32.totalorder %s6174_s13, %s6583_s2 }
  0x4c   :  { %p6180_p6 = pnand %p6178_p5, %p6175_p4 }
  0x4e   :  { %6183 = shalt.err (!%p6180_p6)
}
  0x4f   :  { %s6184_s0 = scalar_lea.vmem %s48_s29, 112  ;;  %s6188_s15 = scalar_lea.vmem %s48_s29, 128 }
  0x50   :  { %p6185_p7 = scmp.ne.s32.totalorder %s48_s29, %s6184_s0  ;;  %p6189_p8 = scmp.lt.s32.totalorder %s48_s29, %s48_s29 }
  0x51   :  { %p6190_p9 = scmp.lt.s32.totalorder %s6188_s15, %s6184_s0 }
  0x53   :  { %p6191_p10 = por %p6190_p9, %p6189_p8 }
  0x55   :  { %p6192_p11 = pnand %p6191_p10, %p6185_p7 }
  0x57   :  { %6195 = shalt.err (!%p6192_p11)
}
  0x58   :  { %50 = dma.hbm_to_vmem [thread:$0]  %s6583_s2, 112, %s48_s29, [#allocation6]  }
  0x59   :  { %s6196_s21 = scalar_lea.hbm %s6585_s4, 112 }
  0x5a   :  { %p6197_p12 = scmp.ne.s32.totalorder %s6585_s4, %s6196_s21  ;;  %p6200_p13 = scmp.lt.u32.totalorder %s6196_s21, %s6585_s4 }
  0x5c   :  { %p6202_p0 = pnand %p6200_p13, %p6197_p12 }
  0x5e   :  { %6205 = shalt.err (!%p6202_p0)
}
  0x5f   :  { %s6206_s1 = scalar_lea.vmem %s70_s8, 112  ;;  %s6210_s25 = scalar_lea.vmem %s70_s8, 128 }
  0x60   :  { %p6207_p1 = scmp.ne.s32.totalorder %s70_s8, %s6206_s1  ;;  %p6211_p2 = scmp.lt.s32.totalorder %s70_s8, %s70_s8 }
  0x61   :  { %p6212_p3 = scmp.lt.s32.totalorder %s6210_s25, %s6206_s1 }
  0x63   :  { %p6213_p4 = por %p6212_p3, %p6211_p2 }
  0x65   :  { %p6214_p5 = pnand %p6213_p4, %p6207_p1 }
  0x67   :  { %6217 = shalt.err (!%p6214_p5)
}
  0x68   :  { %72 = dma.hbm_to_vmem [thread:$0]  %s6585_s4, 112, %s70_s8, [#allocation9]  }
  0x69   :  { %s6284_s28 = smov [#allocation13]   ;;  %s6218_s10 = scalar_lea.hbm %s6587_s6, 16 }
  0x6a   :  { %s91_s29 = sshll.u32 %s6284_s28, 4  ;;  %p6219_p6 = scmp.ne.s32.totalorder %s6587_s6, %s6218_s10  ;;  %s92_s29 = int_to_ptr.vmem [resolvable:$true] %s91_s29 }
  0x6b   :  { %p6222_p7 = scmp.lt.u32.totalorder %s6218_s10, %s6587_s6 }
  0x6d   :  { %p6224_p8 = pnand %p6222_p7, %p6219_p6 }
  0x6f   :  { %6227 = shalt.err (!%p6224_p8)
}
  0x70   :  { %s6228_s12 = scalar_lea.vmem %s92_s29, 16  ;;  %s6232_s4 = scalar_lea.vmem %s92_s29, 32 }
  0x71   :  { %p6229_p9 = scmp.ne.s32.totalorder %s92_s29, %s6228_s12  ;;  %p6233_p10 = scmp.lt.s32.totalorder %s92_s29, %s92_s29 }
  0x72   :  { %p6234_p11 = scmp.lt.s32.totalorder %s6232_s4, %s6228_s12 }
  0x74   :  { %p6235_p12 = por %p6234_p11, %p6233_p10 }
  0x76   :  { %p6236_p13 = pnand %p6235_p12, %p6229_p9 }
  0x78   :  { %6239 = shalt.err (!%p6236_p13)
}
  0x79   :  { %94 = dma.hbm_to_vmem [thread:$0]  %s6587_s6, 16, %s92_s29, [#allocation12]  }
  0x7a   :  { %6262 = dma.done.wait [#allocation3], 256  }
  0x7b   :  { %6263 = vsyncadd [#allocation3], 4294967040 }
  0x7c   :  { %6264 = dma.done.wait [#allocation6], 7280  }
  0x7d   :  { %6265 = vsyncadd [#allocation6], 4294960016 }
  0x7e   :  { %6266 = dma.done.wait [#allocation9], 50288  }
  0x7f   :  { %6267 = vsyncadd [#allocation9], 4294917008 }
  0x80   :  { %6268 = dma.done.wait [#allocation12], 7184  }
  0x81   :  { %6269 = vsyncadd [#allocation12], 4294960112  ;;  %v6285_v0 = vmov 0   ;;  %v5390_v1 = vld [vmem:[#allocation5 + $0x4] ss:$28 sps:$4 sm:$0xff]   ;;  %v117_v26 = vld [vmem:[#allocation2] sm:$0xff] }
  0x82   :  { %541 = vmatprep.mubr.bf16.mxu0 %v6285_v0  ;;  %584 = vmatprep.mubr.bf16.mxu1 %v6285_v0  ;;  %v5392_v2 = vld [vmem:[#allocation5] ss:$28 sps:$4 sm:$0xff]   ;;  %v5395_v4 = vld [vmem:[#allocation5 + $0x38] ss:$28 sps:$4 sm:$0xff]   ;;  %v5398_v6 = vld [vmem:[#allocation5 + $0x70] ss:$28 sps:$4 sm:$0xff]  }
  0x83   :  { %509 = vmatprep.subr.bf16.mxu0 %v5390_v1  ;;  %v5393_v3 = vld [vmem:[#allocation5 + $0x3c] ss:$28 sps:$4 sm:$0xff]   ;;  %v5396_v5 = vld [vmem:[#allocation5 + $0x74] ss:$28 sps:$4 sm:$0xff]   ;;  %v5399_v7 = vld [vmem:[#allocation5 + $0xac] ss:$28 sps:$4 sm:$0xff]  }
  0x84   :  { %510 = vmatpush1.bf16.msra.mxu0 %v5392_v2  ;;  %v5401_v8 = vld [vmem:[#allocation5 + $0xa8] ss:$28 sps:$4 sm:$0xff]   ;;  %v5404_v13 = vld [vmem:[#allocation5 + $0xe0] ss:$28 sps:$4 sm:$0xff]   ;;  %v5407_v17 = vld [vmem:[#allocation5 + $0x118] ss:$28 sps:$4 sm:$0xff]  }
  0x85   :  { %511 = vmatprep.subr.bf16.mxu0 %v5393_v3  ;;  %v5402_v9 = vld [vmem:[#allocation5 + $0xe4] ss:$28 sps:$4 sm:$0xff]   ;;  %v5414_v10 = vld [vmem:[#allocation5 + $0xc] ss:$28 sps:$4 sm:$0xff]   ;;  %v5405_v15 = vld [vmem:[#allocation5 + $0x11c] ss:$28 sps:$4 sm:$0xff]  }
  0x86   :  { %v5416_v11 = vld [vmem:[#allocation5 + $0x8] ss:$28 sps:$4 sm:$0xff]   ;;  %552 = vmatprep.subr.bf16.mxu1 %v5414_v10  ;;  %v5419_v14 = vld [vmem:[#allocation5 + $0x40] ss:$28 sps:$4 sm:$0xff]   ;;  %v5422_v18 = vld [vmem:[#allocation5 + $0x78] ss:$28 sps:$4 sm:$0xff]  }
  0x87   :  { %v5417_v12 = vld [vmem:[#allocation5 + $0x44] ss:$28 sps:$4 sm:$0xff]   ;;  %553 = vmatpush1.bf16.msra.mxu1 %v5416_v11  ;;  %v5420_v16 = vld [vmem:[#allocation5 + $0x7c] ss:$28 sps:$4 sm:$0xff]   ;;  %v5408_v19 = vld [vmem:[#allocation5 + $0x154] ss:$28 sps:$4 sm:$0xff]  }
  0x88   :  { %512 = vmatpush1.bf16.msra.mxu0 %v5395_v4  ;;  %554 = vmatprep.subr.bf16.mxu1 %v5417_v12  ;;  %v5423_v20 = vld [vmem:[#allocation5 + $0xb4] ss:$28 sps:$4 sm:$0xff]   ;;  %v5411_v23 = vld [vmem:[#allocation5 + $0x18c] ss:$28 sps:$4 sm:$0xff]   ;;  %v118_v27 = vld [vmem:[#allocation2 + $0x8] sm:$0xff]  ;;  %v6286_v46 = vmov 0.0  }
  0x89   :  { %513 = vmatprep.subr.bf16.mxu0 %v5396_v5  ;;  %v5410_v21 = vld [vmem:[#allocation5 + $0x150] ss:$28 sps:$4 sm:$0xff]   ;;  %v5413_v25 = vld [vmem:[#allocation5 + $0x188] ss:$28 sps:$4 sm:$0xff]   ;;  %v6418_v31 = vpack.c.bf16 %v118_v27, %v117_v26  ;;  %v5431_v32 = vld [vmem:[#allocation5 + $0x120] ss:$28 sps:$4 sm:$0xff]  }
  0x8a   :  { %v5425_v22 = vld [vmem:[#allocation5 + $0xb0] ss:$28 sps:$4 sm:$0xff]   ;;  %v5428_v28 = vld [vmem:[#allocation5 + $0xe8] ss:$28 sps:$4 sm:$0xff]   ;;  %v5432_v34 = vld [vmem:[#allocation5 + $0x15c] ss:$28 sps:$4 sm:$0xff]  }
  0x8b   :  { %555 = vmatpush1.bf16.msra.mxu1 %v5419_v14  ;;  %v5426_v24 = vld [vmem:[#allocation5 + $0xec] ss:$28 sps:$4 sm:$0xff]   ;;  %v5429_v29 = vld [vmem:[#allocation5 + $0x124] ss:$28 sps:$4 sm:$0xff]   ;;  %v5440_v30 = vld [vmem:[#allocation5 + $0x14] ss:$28 sps:$4 sm:$0xff]  }
  0x8c   :  { %514 = vmatpush1.bf16.msra.mxu0 %v5398_v6  ;;  %556 = vmatprep.subr.bf16.mxu1 %v5420_v16  ;;  %v5438_v33 = vld [vmem:[#allocation5 + $0x10] ss:$28 sps:$4 sm:$0xff]   ;;  %v5434_v36 = vld [vmem:[#allocation5 + $0x158] ss:$28 sps:$4 sm:$0xff]   ;;  %v5441_v38 = vld [vmem:[#allocation5 + $0x48] ss:$28 sps:$4 sm:$0xff]  }
  0x8d   :  { %515 = vmatprep.subr.bf16.mxu0 %v5399_v7  ;;  %v5443_v35 = vld [vmem:[#allocation5 + $0x4c] ss:$28 sps:$4 sm:$0xff]   ;;  %v5435_v37 = vld [vmem:[#allocation5 + $0x194] ss:$28 sps:$4 sm:$0xff]   ;;  %v5446_v39 = vld [vmem:[#allocation5 + $0x84] ss:$28 sps:$4 sm:$0xff]  }
  0x8e   :  { %v5437_v40 = vld [vmem:[#allocation5 + $0x190] ss:$28 sps:$4 sm:$0xff]   ;;  %v5444_v41 = vld [vmem:[#allocation5 + $0x80] ss:$28 sps:$4 sm:$0xff]   ;;  %v5447_v43 = vld [vmem:[#allocation5 + $0xb8] ss:$28 sps:$4 sm:$0xff]  }
  0x8f   :  { %557 = vmatpush1.bf16.msra.mxu1 %v5422_v18  ;;  %v5449_v42 = vld [vmem:[#allocation5 + $0xbc] ss:$28 sps:$4 sm:$0xff]   ;;  %v5452_v45 = vld [vmem:[#allocation5 + $0xf4] ss:$28 sps:$4 sm:$0xff]   ;;  %v5455_v49 = vld [vmem:[#allocation5 + $0x12c] ss:$28 sps:$4 sm:$0xff]  }
  0x90   :  { %516 = vmatpush1.bf16.msra.mxu0 %v5401_v8  ;;  %558 = vmatprep.subr.bf16.mxu1 %v5423_v20  ;;  %v5462_v44 = vld [vmem:[#allocation5 + $0x18] ss:$28 sps:$4 sm:$0xff]   ;;  %v5450_v47 = vld [vmem:[#allocation5 + $0xf0] ss:$28 sps:$4 sm:$0xff]   ;;  %vm6287_vm0 = vmmov 0   ;;  %s6288_s6 = smov [#allocation14]  }
  0x91   :  { %517 = vmatprep.subr.bf16.mxu0 %v5402_v9  ;;  %v5463_v48 = vld [vmem:[#allocation5 + $0x50] ss:$28 sps:$4 sm:$0xff]   ;;  %v5453_v50 = vld [vmem:[#allocation5 + $0x128] ss:$28 sps:$4 sm:$0xff]   ;;  %v5456_v53 = vld [vmem:[#allocation5 + $0x160] ss:$28 sps:$4 sm:$0xff]  }
  0x92   :  { %v5464_v51 = vld [vmem:[#allocation5 + $0x88] ss:$28 sps:$4 sm:$0xff]   ;;  %v5465_v54 = vld [vmem:[#allocation5 + $0xc0] ss:$28 sps:$4 sm:$0xff]   ;;  %v5459_v56 = vld [vmem:[#allocation5 + $0x198] ss:$28 sps:$4 sm:$0xff]  }
  0x93   :  { %559 = vmatpush1.bf16.msra.mxu1 %v5425_v22  ;;  %v5458_v52 = vld [vmem:[#allocation5 + $0x164] ss:$28 sps:$4 sm:$0xff]   ;;  %v5461_v55 = vld [vmem:[#allocation5 + $0x19c] ss:$28 sps:$4 sm:$0xff]   ;;  %v5472_v58 = vld [vmem:[#allocation8 + $0x4] ss:$28 sps:$4 sm:$0xff]  }
  0x94   :  { %518 = vmatpush1.bf16.msra.mxu0 %v5404_v13  ;;  %560 = vmatprep.subr.bf16.mxu1 %v5426_v24  ;;  %v5466_v57 = vld [vmem:[#allocation5 + $0xf8] ss:$28 sps:$4 sm:$0xff]   ;;  %v5467_v59 = vld [vmem:[#allocation5 + $0x130] ss:$28 sps:$4 sm:$0xff]   ;;  %v5470_v60 = vld [vmem:[#allocation8] ss:$28 sps:$4 sm:$0xff]  }
  0x95   :  { %519 = vmatprep.subr.bf16.mxu0 %v5405_v15  ;;  %v5478_v61 = vld [vmem:[#allocation8 + $0x3c] ss:$28 sps:$4 sm:$0xff]   ;;  %v5484_v1 = vld [vmem:[#allocation8 + $0x74] ss:$28 sps:$4 sm:$0xff]   ;;  %v5475_v4 = vld [vmem:[#allocation8 + $0xc] ss:$28 sps:$4 sm:$0xff]  }
  0x96   :  { %v5468_v62 = vld [vmem:[#allocation5 + $0x168] ss:$28 sps:$4 sm:$0xff]   ;;  %v5476_v63 = vld [vmem:[#allocation8 + $0x38] ss:$28 sps:$4 sm:$0xff]   ;;  %v5482_v3 = vld [vmem:[#allocation8 + $0x70] ss:$28 sps:$4 sm:$0xff]  }
  0x97   :  { %561 = vmatpush1.bf16.msra.mxu1 %v5428_v28  ;;  %v5469_v2 = vld [vmem:[#allocation5 + $0x1a0] ss:$28 sps:$4 sm:$0xff]   ;;  %v5490_v5 = vld [vmem:[#allocation8 + $0xac] ss:$28 sps:$4 sm:$0xff]   ;;  %v5481_v8 = vld [vmem:[#allocation8 + $0x44] ss:$28 sps:$4 sm:$0xff]  }
  0x98   :  { %520 = vmatpush1.bf16.msra.mxu0 %v5407_v17  ;;  %562 = vmatprep.subr.bf16.mxu1 %v5429_v29  ;;  %v5473_v6 = vld [vmem:[#allocation8 + $0x8] ss:$28 sps:$4 sm:$0xff]   ;;  %v5479_v10 = vld [vmem:[#allocation8 + $0x40] ss:$28 sps:$4 sm:$0xff]   ;;  %v5485_v14 = vld [vmem:[#allocation8 + $0x78] ss:$28 sps:$4 sm:$0xff]  }
  0x99   :  { %521 = vmatprep.subr.bf16.mxu0 %v5408_v19  ;;  %v5488_v7 = vld [vmem:[#allocation8 + $0xa8] ss:$28 sps:$4 sm:$0xff]   ;;  %v5494_v11 = vld [vmem:[#allocation8 + $0xe0] ss:$28 sps:$4 sm:$0xff]   ;;  %v5500_v15 = vld [vmem:[#allocation8 + $0x118] ss:$28 sps:$4 sm:$0xff]  }
  0x9a   :  { %v5496_v9 = vld [vmem:[#allocation8 + $0xe4] ss:$28 sps:$4 sm:$0xff]   ;;  %v5487_v12 = vld [vmem:[#allocation8 + $0x7c] ss:$28 sps:$4 sm:$0xff]   ;;  %v5493_v16 = vld [vmem:[#allocation8 + $0xb4] ss:$28 sps:$4 sm:$0xff]  }
  0x9b   :  { %563 = vmatpush1.bf16.msra.mxu1 %v5431_v32  ;;  %v5502_v13 = vld [vmem:[#allocation8 + $0x11c] ss:$28 sps:$4 sm:$0xff]   ;;  %v5508_v17 = vld [vmem:[#allocation8 + $0x154] ss:$28 sps:$4 sm:$0xff]   ;;  %v5499_v20 = vld [vmem:[#allocation8 + $0xec] ss:$28 sps:$4 sm:$0xff]  }
  0x9c   :  { %522 = vmatpush1.bf16.msra.mxu0 %v5410_v21  ;;  %564 = vmatprep.subr.bf16.mxu1 %v5432_v34  ;;  %v5491_v18 = vld [vmem:[#allocation8 + $0xb0] ss:$28 sps:$4 sm:$0xff]   ;;  %v5497_v22 = vld [vmem:[#allocation8 + $0xe8] ss:$28 sps:$4 sm:$0xff]   ;;  %v5503_v26 = vld [vmem:[#allocation8 + $0x120] ss:$28 sps:$4 sm:$0xff]  }
  0x9d   :  { %523 = vmatprep.subr.bf16.mxu0 %v5411_v23  ;;  %v5506_v19 = vld [vmem:[#allocation8 + $0x150] ss:$28 sps:$4 sm:$0xff]   ;;  %v5512_v23 = vld [vmem:[#allocation8 + $0x188] ss:$28 sps:$4 sm:$0xff]   ;;  %v5518_v27 = vld [vmem:[#allocation8 + $0x1c0] ss:$28 sps:$4 sm:$0xff]  }
  0x9e   :  { %v5514_v21 = vld [vmem:[#allocation8 + $0x18c] ss:$28 sps:$4 sm:$0xff]   ;;  %v5505_v24 = vld [vmem:[#allocation8 + $0x124] ss:$28 sps:$4 sm:$0xff]   ;;  %v5511_v28 = vld [vmem:[#allocation8 + $0x15c] ss:$28 sps:$4 sm:$0xff]  }
  0x9f   :  { %565 = vmatpush1.bf16.msra.mxu1 %v5434_v36  ;;  %v5526_v29 = vld [vmem:[#allocation8 + $0x1fc] ss:$28 sps:$4 sm:$0xff]   ;;  %v5517_v32 = vld [vmem:[#allocation8 + $0x194] ss:$28 sps:$4 sm:$0xff]   ;;  %v5523_v36 = vld [vmem:[#allocation8 + $0x1cc] ss:$28 sps:$4 sm:$0xff]  }
  0xa0   :  { %524 = vmatpush1.bf16.msra.mxu0 %v5413_v25  ;;  %566 = vmatprep.subr.bf16.mxu1 %v5435_v37  ;;  %v5520_v25 = vld [vmem:[#allocation8 + $0x1c4] ss:$28 sps:$4 sm:$0xff]   ;;  %v5515_v34 = vld [vmem:[#allocation8 + $0x190] ss:$28 sps:$4 sm:$0xff]   ;;  %s4586_s15 = sshll.u32 %s6288_s6, 4  ;;  %s4587_s15 = int_to_ptr.vmem [resolvable:$true] %s4586_s15 }
  0xa1   :  { %595 = vmatprep.subr.bf16.mxu0 %v5440_v30  ;;  %v5509_v30 = vld [vmem:[#allocation8 + $0x158] ss:$28 sps:$4 sm:$0xff]   ;;  %v5538_v37 = vld [vmem:[#allocation8 + $0x26c] ss:$28 sps:$4 sm:$0xff]   ;;  %s6240_s16 = scalar_lea.vmem %s4587_s15, 256  ;;  %p6245_p1 = scmp.lt.s32.totalorder %s4587_s15, %s4587_s15 }
  0xa2   :  { %p6241_p0 = scmp.ne.s32.totalorder %s4587_s15, %s6240_s16  ;;  %p6246_p2 = scmp.lt.s32.totalorder %s6240_s16, %s6240_s16 }
  0xa3   :  { %542 = vmatmul.mubr.bf16.vlgmr.msra.gmra.mrb[0].mxu0 %v6418_v31  ;;  %567 = vmatpush1.bf16.msra.mxu1 %v5437_v40  ;;  %v5529_v40 = vld [vmem:[#allocation8 + $0x204] ss:$28 sps:$4 sm:$0xff]  }
  0xa4   :  { %596 = vmatpush1.bf16.msra.mxu0 %v5438_v33  ;;  %627 = vmatprep.mubr.bf16.mxu0 %v6285_v0  ;;  %v5532_v33 = vld [vmem:[#allocation8 + $0x234] ss:$28 sps:$4 sm:$0xff]   ;;  %p6247_p3 = por %p6246_p2, %p6245_p1 }
  0xa5   :  { %597 = vmatprep.subr.bf16.mxu0 %v5443_v35  ;;  %5265 = vmatprep.subr.bf16.mxu1 %v6286_v46  ;;  %v5530_v35 = vld [vmem:[#allocation8 + $0x230] ss:$28 sps:$4 sm:$0xff]  }
  0xa6   :  { %585 = vmatmul.mubr.bf16.vlgmr.msra.gmra.mrb[0].mxu1 %v6418_v31  ;;  %p6248_p4 = pnand %p6247_p3, %p6241_p0 }
  0xa7   :  { %5266 = vmatpush3.bf16.msra.mxu1 %v5462_v44  ;;  %5281 = vmatprep.mubr.msk.bf16.mxu1 %vm6287_vm0, %v6286_v46  ;;  %v5535_v44 = vld [vmem:[#allocation8 + $0x23c] ss:$28 sps:$4 sm:$0xff]  }
  0xa8   :  { %598 = vmatpush1.bf16.msra.mxu0 %v5441_v38  ;;  %5267 = vmatprep.subr.bf16.mxu1 %v6286_v46  ;;  %v5521_v38 = vld [vmem:[#allocation8 + $0x1c8] ss:$28 sps:$4 sm:$0xff]  }
  0xa9   :  { %599 = vmatprep.subr.bf16.mxu0 %v5446_v39  ;;  %v5536_v39 = vld [vmem:[#allocation8 + $0x268] ss:$28 sps:$4 sm:$0xff]  }
  0xab   :  { %5268 = vmatpush3.bf16.msra.mxu1 %v5463_v48  ;;  %v5548_v48 = vld [vmem:[#allocation8 + $0x2d8] ss:$28 sps:$4 sm:$0xff]  }
  0xac   :  { %600 = vmatpush1.bf16.msra.mxu0 %v5444_v41  ;;  %5269 = vmatprep.subr.bf16.mxu1 %v6286_v46  ;;  %v5544_v41 = vld [vmem:[#allocation8 + $0x2a4] ss:$28 sps:$4 sm:$0xff]  }
  0xad   :  { %601 = vmatprep.subr.bf16.mxu0 %v5449_v42  ;;  %v5527_v42 = vld [vmem:[#allocation8 + $0x200] ss:$28 sps:$4 sm:$0xff]  }
  0xaf   :  { %5270 = vmatpush3.bf16.msra.mxu1 %v5464_v51  ;;  %v5556_v51 = vld [vmem:[#allocation8 + $0x314] ss:$28 sps:$4 sm:$0xff]  }
  0xb0   :  { %602 = vmatpush1.bf16.msra.mxu0 %v5447_v43  ;;  %5271 = vmatprep.subr.bf16.mxu1 %v6286_v46  ;;  %v5542_v43 = vld [vmem:[#allocation8 + $0x2a0] ss:$28 sps:$4 sm:$0xff]  }
  0xb1   :  { %603 = vmatprep.subr.bf16.mxu0 %v5452_v45  ;;  %v5550_v45 = vld [vmem:[#allocation8 + $0x2dc] ss:$28 sps:$4 sm:$0xff]  }
  0xb3   :  { %5272 = vmatpush3.bf16.msra.mxu1 %v5465_v54  ;;  %v5545_v54 = vld [vmem:[#allocation8 + $0x2a8] ss:$28 sps:$4 sm:$0xff]  }
  0xb4   :  { %604 = vmatpush1.bf16.msra.mxu0 %v5450_v47  ;;  %5273 = vmatprep.subr.bf16.mxu1 %v6286_v46  ;;  %v5533_v47 = vld [vmem:[#allocation8 + $0x238] ss:$28 sps:$4 sm:$0xff]  }
  0xb5   :  { %605 = vmatprep.subr.bf16.mxu0 %v5455_v49  ;;  %v5541_v49 = vld [vmem:[#allocation8 + $0x274] ss:$28 sps:$4 sm:$0xff]  }
  0xb7   :  { %5274 = vmatpush3.bf16.msra.mxu1 %v5466_v57  ;;  %v5560_v57 = vld [vmem:[#allocation8 + $0x348] ss:$28 sps:$4 sm:$0xff]  }
  0xb8   :  { %606 = vmatpush1.bf16.msra.mxu0 %v5453_v50  ;;  %5275 = vmatprep.subr.bf16.mxu1 %v6286_v46  ;;  %v5539_v50 = vld [vmem:[#allocation8 + $0x270] ss:$28 sps:$4 sm:$0xff]  }
  0xb9   :  { %607 = vmatprep.subr.bf16.mxu0 %v5458_v52  ;;  %v5547_v52 = vld [vmem:[#allocation8 + $0x2ac] ss:$28 sps:$4 sm:$0xff]  }
  0xbb   :  { %5276 = vmatpush3.bf16.msra.mxu1 %v5467_v59  ;;  %v5551_v59 = vld [vmem:[#allocation8 + $0x2e0] ss:$28 sps:$4 sm:$0xff]  }
  0xbc   :  { %608 = vmatpush1.bf16.msra.mxu0 %v5456_v53  ;;  %5277 = vmatprep.subr.bf16.mxu1 %v6286_v46  ;;  %v5554_v53 = vld [vmem:[#allocation8 + $0x310] ss:$28 sps:$4 sm:$0xff]  }
  0xbd   :  { %609 = vmatprep.subr.bf16.mxu0 %v5461_v55  ;;  %v5562_v55 = vld [vmem:[#allocation8 + $0x34c] ss:$28 sps:$4 sm:$0xff]  }
  0xbf   :  { %5278 = vmatpush3.bf16.msra.mxu1 %v5468_v62  ;;  %v5565_v62 = vld [vmem:[#allocation8 + $0x354] ss:$28 sps:$4 sm:$0xff]  }
  0xc0   :  { %610 = vmatpush1.bf16.msra.mxu0 %v5459_v56  ;;  %5279 = vmatprep.subr.bf16.mxu1 %v6286_v46  ;;  %v5553_v56 = vld [vmem:[#allocation8 + $0x2e4] ss:$28 sps:$4 sm:$0xff]  }
  0xc1   :  { %3229 = vmatprep.subr.bf16.mxu0 %v5472_v58  ;;  %v5568_v58 = vld [vmem:[#allocation8 + $0x384] ss:$28 sps:$4 sm:$0xff]  }
  0xc3   :  { %628 = vmatmul.mubr.bf16.vlgmr.msra.gmra.mrb[4].mxu0 %v6418_v31  ;;  %5280 = vmatpush3.bf16.msra.mxu1 %v5469_v2  ;;  %v186_v2 = vlaneseq }
  0xc4   :  { %3230 = vmatpush1.bf16.msra.mxu0 %v5470_v60  ;;  %3401 = vmatprep.subr.bf16.mxu1 %v5475_v4  ;;  %v5559_v60 = vld [vmem:[#allocation8 + $0x31c] ss:$28 sps:$4 sm:$0xff]  }
  0xc5   :  { %3231 = vmatprep.subr.bf16.mxu0 %v5478_v61  ;;  %v5557_v61 = vld [vmem:[#allocation8 + $0x318] ss:$28 sps:$4 sm:$0xff]  }
  0xc6   :  { %5282 = vmatmul.mubr.bf16.vlgmr.msra.gmra.mrb[4].mxu1 %v6418_v31  ;;  %v5524_v31 = vld [vmem:[#allocation8 + $0x1f8] ss:$28 sps:$4 sm:$0xff]  }
  0xc7   :  { %3402 = vmatpush1.bf16.msra.mxu1 %v5473_v6 }
  0xc8   :  { %3232 = vmatpush1.bf16.msra.mxu0 %v5476_v63  ;;  %3403 = vmatprep.subr.bf16.mxu1 %v5481_v8  ;;  %v5563_v63 = vld [vmem:[#allocation8 + $0x350] ss:$28 sps:$4 sm:$0xff]  }
  0xc9   :  { %3233 = vmatprep.subr.bf16.mxu0 %v5484_v1  ;;  %v5571_v1 = vld [vmem:[#allocation8 + $0x38c] ss:$28 sps:$4 sm:$0xff]  }
  0xcb   :  { %3404 = vmatpush1.bf16.msra.mxu1 %v5479_v10 }
  0xcc   :  { %3234 = vmatpush1.bf16.msra.mxu0 %v5482_v3  ;;  %3405 = vmatprep.subr.bf16.mxu1 %v5487_v12  ;;  %v6435_v3 = vshrl.u32 %v186_v2, 7  ;;  %v5595_v2 = vld [vmem:[#allocation8 + $0x46c] ss:$28 sps:$4 sm:$0xff]  }
  0xcd   :  { %3235 = vmatprep.subr.bf16.mxu0 %v5490_v5  ;;  %v6438_v5 = vld [vmem:[#allocation7] sm:$0xff] }
  0xce   :  { %v188_v4 = vsub.s32 0, %v6435_v3  ;;  %v192_v6 = vsub.s32 1, %v6435_v3 }
  0xcf   :  { %3406 = vmatpush1.bf16.msra.mxu1 %v5485_v14 }
  0xd0   :  { %3236 = vmatpush1.bf16.msra.mxu0 %v5488_v7  ;;  %3407 = vmatprep.subr.bf16.mxu1 %v5493_v16  ;;  %v189_v7 = vrot.slane %v6438_v5, %v188_v4  ;;  %v193_v8 = vrot.slane %v6438_v5, %v192_v6 }
  0xd1   :  { %3237 = vmatprep.subr.bf16.mxu0 %v5496_v9 }
  0xd3   :  { %3408 = vmatpush1.bf16.msra.mxu1 %v5491_v18 }
  0xd4   :  { %3238 = vmatpush1.bf16.msra.mxu0 %v5494_v11  ;;  %3409 = vmatprep.subr.bf16.mxu1 %v5499_v20  ;;  %v196_v20 = vsub.s32 2, %v6435_v3 }
  0xd5   :  { %3239 = vmatprep.subr.bf16.mxu0 %v5502_v13 }
  0xd7   :  { %3410 = vmatpush1.bf16.msra.mxu1 %v5497_v22  ;;  %v200_v22 = vsub.s32 3, %v6435_v3 }
  0xd8   :  { %3240 = vmatpush1.bf16.msra.mxu0 %v5500_v15  ;;  %3411 = vmatprep.subr.bf16.mxu1 %v5505_v24 }
  0xd9   :  { %3241 = vmatprep.subr.bf16.mxu0 %v5508_v17 }
  0xdb   :  { %3412 = vmatpush1.bf16.msra.mxu1 %v5503_v26  ;;  %v5569_v26 = vld [vmem:[#allocation8 + $0x388] ss:$28 sps:$4 sm:$0xff]  }
  0xdc   :  { %3242 = vmatpush1.bf16.msra.mxu0 %v5506_v19  ;;  %3413 = vmatprep.subr.bf16.mxu1 %v5511_v28 }
  0xdd   :  { %3243 = vmatprep.subr.bf16.mxu0 %v5514_v21 }
  0xdf   :  { %3414 = vmatpush1.bf16.msra.mxu1 %v5509_v30 }
  0xe0   :  { %3244 = vmatpush1.bf16.msra.mxu0 %v5512_v23  ;;  %3415 = vmatprep.subr.bf16.mxu1 %v5517_v32  ;;  %v5574_v32 = vld [vmem:[#allocation8 + $0x3bc] ss:$28 sps:$4 sm:$0xff]  }
  0xe1   :  { %3245 = vmatprep.subr.bf16.mxu0 %v5520_v25  ;;  %v5566_v25 = vld [vmem:[#allocation8 + $0x380] ss:$28 sps:$4 sm:$0xff]  }
  0xe3   :  { %3416 = vmatpush1.bf16.msra.mxu1 %v5515_v34  ;;  %v201_v34 = vrot.slane %v6438_v5, %v200_v22 }
  0xe4   :  { %3246 = vmatpush1.bf16.msra.mxu0 %v5518_v27  ;;  %3417 = vmatprep.subr.bf16.mxu1 %v5523_v36  ;;  %v5572_v36 = vld [vmem:[#allocation8 + $0x3b8] ss:$28 sps:$4 sm:$0xff]  }
  0xe5   :  { %3247 = vmatprep.subr.bf16.mxu0 %v5526_v29 }
  0xe7   :  { %3418 = vmatpush1.bf16.msra.mxu1 %v5521_v38 }
  0xe8   :  { %3248 = vmatpush1.bf16.msra.mxu0 %v5524_v31  ;;  %3419 = vmatprep.subr.bf16.mxu1 %v5529_v40  ;;  %v197_v31 = vrot.slane %v6438_v5, %v196_v20  ;;  %v5580_v40 = vld [vmem:[#allocation8 + $0x3f4] ss:$28 sps:$4 sm:$0xff]  }
  0xe9   :  { %3249 = vmatprep.subr.bf16.mxu0 %v5532_v33  ;;  %v5577_v33 = vld [vmem:[#allocation8 + $0x3c4] ss:$28 sps:$4 sm:$0xff]  }
  0xeb   :  { %3420 = vmatpush1.bf16.msra.mxu1 %v5527_v42 }
  0xec   :  { %3250 = vmatpush1.bf16.msra.mxu0 %v5530_v35  ;;  %3421 = vmatprep.subr.bf16.mxu1 %v5535_v44  ;;  %v5578_v44 = vld [vmem:[#allocation8 + $0x3f0] ss:$28 sps:$4 sm:$0xff]  }
  0xed   :  { %3251 = vmatprep.subr.bf16.mxu0 %v5538_v37  ;;  %v5575_v37 = vld [vmem:[#allocation8 + $0x3c0] ss:$28 sps:$4 sm:$0xff]  }
  0xef   :  { %3422 = vmatpush1.bf16.msra.mxu1 %v5533_v47 }
  0xf0   :  { %3252 = vmatpush1.bf16.msra.mxu0 %v5536_v39  ;;  %3423 = vmatprep.subr.bf16.mxu1 %v5541_v49 }
  0xf1   :  { %3253 = vmatprep.subr.bf16.mxu0 %v5544_v41  ;;  %v5583_v41 = vld [vmem:[#allocation8 + $0x3fc] ss:$28 sps:$4 sm:$0xff]  }
  0xf3   :  { %3424 = vmatpush1.bf16.msra.mxu1 %v5539_v50 }
  0xf4   :  { %3254 = vmatpush1.bf16.msra.mxu0 %v5542_v43  ;;  %3425 = vmatprep.subr.bf16.mxu1 %v5547_v52  ;;  %v5586_v52 = vld [vmem:[#allocation8 + $0x42c] ss:$28 sps:$4 sm:$0xff]  }
  0xf5   :  { %3255 = vmatprep.subr.bf16.mxu0 %v5550_v45  ;;  %v5581_v45 = vld [vmem:[#allocation8 + $0x3f8] ss:$28 sps:$4 sm:$0xff]  }
  0xf7   :  { %3426 = vmatpush1.bf16.msra.mxu1 %v5545_v54 }
  0xf8   :  { %3256 = vmatpush1.bf16.msra.mxu0 %v5548_v48  ;;  %3427 = vmatprep.subr.bf16.mxu1 %v5553_v56 }
  0xf9   :  { %3257 = vmatprep.subr.bf16.mxu0 %v5556_v51 }
  0xfb   :  { %3428 = vmatpush1.bf16.msra.mxu1 %v5551_v59 }
  0xfc   :  { %3258 = vmatpush1.bf16.msra.mxu0 %v5554_v53  ;;  %3429 = vmatprep.subr.bf16.mxu1 %v5559_v60 }
  0xfd   :  { %3259 = vmatprep.subr.bf16.mxu0 %v5562_v55  ;;  %v5589_v55 = vld [vmem:[#allocation8 + $0x434] ss:$28 sps:$4 sm:$0xff]  }
  0xff   :  { %3430 = vmatpush1.bf16.msra.mxu1 %v5557_v61  ;;  %v5584_v61 = vld [vmem:[#allocation8 + $0x428] ss:$28 sps:$4 sm:$0xff]  }
 0x100   :  { %3260 = vmatpush1.bf16.msra.mxu0 %v5560_v57  ;;  %3431 = vmatprep.subr.bf16.mxu1 %v5565_v62  ;;  %v5587_v62 = vld [vmem:[#allocation8 + $0x430] ss:$28 sps:$4 sm:$0xff]  }
 0x101   :  { %3272 = vmatprep.subr.bf16.mxu0 %v5568_v58 }
 0x103   :  { %3432 = vmatpush1.bf16.msra.mxu1 %v5563_v63 }
 0x104   :  { %3444 = vmatprep.subr.bf16.mxu1 %v5571_v1  ;;  %v5592_v1 = vld [vmem:[#allocation8 + $0x464] ss:$28 sps:$4 sm:$0xff]  }
 0x176   :  { %v543_v9 = vpop.f32.mrb[0].mxu0 }
 0x177   :  { %v544_v10 = vadd.f32 %v543_v9, %v189_v7  ;;  %v545_v11 = vpop.f32.mrb[1].mxu0  ;;  %v5598_v9 = vld [vmem:[#allocation8 + $0x49c] ss:$28 sps:$4 sm:$0xff]  }
 0x178   :  { %v546_v12 = vadd.f32 %v545_v11, %v193_v8  ;;  %v547_v13 = vpop.f32.mrb[2].mxu0  ;;  %v5601_v11 = vld [vmem:[#allocation8 + $0x4a4] ss:$28 sps:$4 sm:$0xff]  }
 0x179   :  { %v693_v14 = vmul.f32 0.01, %v544_v10  ;;  %v548_v15 = vadd.f32 %v547_v13, %v189_v7  ;;  %v549_v16 = vpop.f32.mrb[3].mxu0  ;;  %vm679_vm1 = vcmp.gt.f32.partialorder %v544_v10, 0.0  ;;  %v586_v35 = vpop.f32.mrb[0].mxu1 }
 0x17a   :  { %v694_v17 = vmul.f32 0.01, %v546_v12  ;;  %v550_v18 = vadd.f32 %v549_v16, %v193_v8  ;;  %vm680_vm2 = vcmp.gt.f32.partialorder %v546_v12, 0.0  ;;  %v587_v38 = vadd.f32 %v586_v35, %v197_v31  ;;  %v588_v39 = vpop.f32.mrb[1].mxu1  ;;  %v5590_v7 = vld [vmem:[#allocation8 + $0x460] ss:$28 sps:$4 sm:$0xff]  }
 0x17b   :  { %vm686_vm3 = vcmp.gt.f32.partialorder %v548_v15, 0.0  ;;  %v700_v19 = vmul.f32 0.01, %v548_v15  ;;  %v707_v23 = vsel %vm679_vm1, %v544_v10, %v693_v14  ;;  %v589_v42 = vadd.f32 %v588_v39, %v201_v34  ;;  %v590_v43 = vpop.f32.mrb[2].mxu1  ;;  %v5593_v8 = vld [vmem:[#allocation8 + $0x468] ss:$28 sps:$4 sm:$0xff]  }
 0x17c   :  { %vm687_vm4 = vcmp.gt.f32.partialorder %v550_v18, 0.0  ;;  %v701_v21 = vmul.f32 0.01, %v550_v18  ;;  %v708_v27 = vsel %vm680_vm2, %v546_v12, %v694_v17  ;;  %vm681_vm5 = vcmp.gt.f32.partialorder %v587_v38, 0.0  ;;  %v592_v49 = vpop.f32.mrb[3].mxu1 }
 0x17d   :  { %v714_v24 = vsel %vm686_vm3, %v548_v15, %v700_v19  ;;  %v695_v47 = vmul.f32 0.01, %v587_v38  ;;  %v591_v48 = vadd.f32 %v590_v43, %v197_v31  ;;  %vm682_vm6 = vcmp.gt.f32.partialorder %v589_v42, 0.0  ;;  %v5596_v13 = vld [vmem:[#allocation8 + $0x498] ss:$28 sps:$4 sm:$0xff]  }
 0x17e   :  { %v6449_v28 = vpack.c.bf16 %v714_v24, %v707_v23  ;;  %v715_v29 = vsel %vm687_vm4, %v550_v18, %v701_v21  ;;  %v696_v50 = vmul.f32 0.01, %v589_v42  ;;  %v593_v51 = vadd.f32 %v592_v49, %v201_v34  ;;  %v5599_v14 = vld [vmem:[#allocation8 + $0x4a0] ss:$28 sps:$4 sm:$0xff]   ;;  %v5604_v16 = vld [vmem:[#allocation8 + $0x4d4] ss:$28 sps:$4 sm:$0xff]  }
 0x17f   :  { %v6451_v30 = vpack.c.bf16 %v715_v29, %v708_v27  ;;  %v709_v53 = vsel %vm681_vm5, %v587_v38, %v695_v47  ;;  %vm688_vm7 = vcmp.gt.f32.partialorder %v591_v48, 0.0  ;;  %v702_v54 = vmul.f32 0.01, %v591_v48  ;;  %v5607_v17 = vld [vmem:[#allocation8 + $0x4dc] ss:$28 sps:$4 sm:$0xff]  }
 0x180   :  { %v710_v56 = vsel %vm682_vm6, %v589_v42, %v696_v50  ;;  %vm689_vm8 = vcmp.gt.f32.partialorder %v593_v51, 0.0  ;;  %v703_v57 = vmul.f32 0.01, %v593_v51  ;;  %v204_v10 = vsub.s32 4, %v6435_v3  ;;  %v5602_v21 = vld [vmem:[#allocation8 + $0x4d0] ss:$28 sps:$4 sm:$0xff]  }
 0x181   :  { %3261 = vmatprep.mubr.bf16.mxu0 %v6451_v30  ;;  %3433 = vmatprep.mubr.bf16.mxu1 %v6451_v30  ;;  %v716_v58 = vsel %vm688_vm7, %v591_v48, %v702_v54  ;;  %v208_v12 = vsub.s32 5, %v6435_v3  ;;  %v5605_v23 = vld [vmem:[#allocation8 + $0x4d8] ss:$28 sps:$4 sm:$0xff]   ;;  %v5616_v39 = vld [vmem:[#allocation8 + $0x544] ss:$28 sps:$4 sm:$0xff]   ;;  %v212_v42 = vsub.s32 6, %v6435_v3 }
 0x182   :  { %3262 = vmatmul.mubr.bf16.vlgmr.msra.gmra.mrb[8].mxu0 %v6449_v28  ;;  %3434 = vmatmul.mubr.bf16.vlgmr.msra.gmra.mrb[8].mxu1 %v6449_v28  ;;  %v6463_v59 = vpack.c.bf16 %v716_v58, %v709_v53  ;;  %v717_v60 = vsel %vm689_vm8, %v593_v51, %v703_v57  ;;  %v205_v15 = vrot.slane %v6438_v5, %v204_v10  ;;  %v5613_v27 = vld [vmem:[#allocation8 + $0x514] ss:$28 sps:$4 sm:$0xff]   ;;  %v5619_v43 = vld [vmem:[#allocation8 + $0x54c] ss:$28 sps:$4 sm:$0xff]   ;;  %v5614_v47 = vld [vmem:[#allocation8 + $0x540] ss:$28 sps:$4 sm:$0xff]  }
 0x183   :  { %3273 = vmatpush1.bf16.msra.mxu0 %v5566_v25  ;;  %3445 = vmatpush1.bf16.msra.mxu1 %v5569_v26  ;;  %v6465_v63 = vpack.c.bf16 %v717_v60, %v710_v56  ;;  %v209_v18 = vrot.slane %v6438_v5, %v208_v12  ;;  %v5610_v26 = vld [vmem:[#allocation8 + $0x50c] ss:$28 sps:$4 sm:$0xff]   ;;  %v213_v53 = vrot.slane %v6438_v5, %v212_v42  ;;  %v5622_v54 = vld [vmem:[#allocation8 + $0x57c] ss:$28 sps:$4 sm:$0xff]  }
 0x184   :  { %3274 = vmatprep.subr.bf16.mxu0 %v5574_v32  ;;  %3446 = vmatprep.subr.bf16.mxu1 %v5577_v33  ;;  %v5608_v32 = vld [vmem:[#allocation8 + $0x508] ss:$28 sps:$4 sm:$0xff]   ;;  %v5611_v33 = vld [vmem:[#allocation8 + $0x510] ss:$28 sps:$4 sm:$0xff]   ;;  %v5620_v56 = vld [vmem:[#allocation8 + $0x578] ss:$28 sps:$4 sm:$0xff]  }
 0x185   :  { %3304 = vmatprep.mubr.bf16.mxu0 %v6465_v63  ;;  %3476 = vmatprep.mubr.bf16.mxu1 %v6465_v63  ;;  %v5617_v48 = vld [vmem:[#allocation8 + $0x548] ss:$28 sps:$4 sm:$0xff]   ;;  %v5623_v57 = vld [vmem:[#allocation8 + $0x580] ss:$28 sps:$4 sm:$0xff]  }
 0x187   :  { %3275 = vmatpush1.bf16.msra.mxu0 %v5572_v36  ;;  %3447 = vmatpush1.bf16.msra.mxu1 %v5575_v37 }
 0x188   :  { %3276 = vmatprep.subr.bf16.mxu0 %v5580_v40  ;;  %3448 = vmatprep.subr.bf16.mxu1 %v5583_v41 }
 0x18b   :  { %3277 = vmatpush1.bf16.msra.mxu0 %v5578_v44  ;;  %3449 = vmatpush1.bf16.msra.mxu1 %v5581_v45 }
 0x18c   :  { %3278 = vmatprep.subr.bf16.mxu0 %v5586_v52  ;;  %3450 = vmatprep.subr.bf16.mxu1 %v5589_v55  ;;  %v5625_v55 = vld [vmem:[#allocation8 + $0x584] ss:$28 sps:$4 sm:$0xff]  }
 0x18f   :  { %3279 = vmatpush1.bf16.msra.mxu0 %v5584_v61  ;;  %3451 = vmatpush1.bf16.msra.mxu1 %v5587_v62  ;;  %v5628_v62 = vld [vmem:[#allocation8 + $0x5b4] ss:$28 sps:$4 sm:$0xff]  }
 0x190   :  { %3280 = vmatprep.subr.bf16.mxu0 %v5592_v1  ;;  %3452 = vmatprep.subr.bf16.mxu1 %v5595_v2  ;;  %v5631_v1 = vld [vmem:[#allocation8 + $0x5bc] ss:$28 sps:$4 sm:$0xff]  }
 0x193   :  { %3281 = vmatpush1.bf16.msra.mxu0 %v5590_v7  ;;  %3453 = vmatpush1.bf16.msra.mxu1 %v5593_v8  ;;  %v5626_v7 = vld [vmem:[#allocation8 + $0x5b0] ss:$28 sps:$4 sm:$0xff]  }
 0x194   :  { %3282 = vmatprep.subr.bf16.mxu0 %v5598_v9  ;;  %3454 = vmatprep.subr.bf16.mxu1 %v5601_v11  ;;  %v5629_v11 = vld [vmem:[#allocation8 + $0x5b8] ss:$28 sps:$4 sm:$0xff]  }
 0x196   :  { %v629_v19 = vpop.f32.mrb[4].mxu0 }
 0x197   :  { %3283 = vmatpush1.bf16.msra.mxu0 %v5596_v13  ;;  %3455 = vmatpush1.bf16.msra.mxu1 %v5599_v14  ;;  %v630_v24 = vadd.f32 %v629_v19, %v205_v15  ;;  %v631_v25 = vpop.f32.mrb[5].mxu0  ;;  %v5635_v19 = vld [vmem:[#allocation8 + $0x5f0] ss:$28 sps:$4 sm:$0xff]  }
 0x198   :  { %3284 = vmatprep.subr.bf16.mxu0 %v5604_v16  ;;  %3456 = vmatprep.subr.bf16.mxu1 %v5607_v17  ;;  %v632_v29 = vadd.f32 %v631_v25, %v209_v18  ;;  %v633_v31 = vpop.f32.mrb[6].mxu0  ;;  %v5637_v16 = vld [vmem:[#allocation8 + $0x5f4] ss:$28 sps:$4 sm:$0xff]   ;;  %v5632_v17 = vld [vmem:[#allocation8 + $0x5e8] ss:$28 sps:$4 sm:$0xff]  }
 0x199   :  { %vm683_vm9 = vcmp.gt.f32.partialorder %v630_v24, 0.0  ;;  %v697_v34 = vmul.f32 0.01, %v630_v24  ;;  %v634_v35 = vadd.f32 %v633_v31, %v205_v15  ;;  %v635_v36 = vpop.f32.mrb[7].mxu0  ;;  %v672_v58 = vpop.f32.mrb[4].mxu1 }
 0x19a   :  { %vm684_vm10 = vcmp.gt.f32.partialorder %v632_v29, 0.0  ;;  %v698_v37 = vmul.f32 0.01, %v632_v29  ;;  %v636_v38 = vadd.f32 %v635_v36, %v209_v18  ;;  %v673_v60 = vadd.f32 %v672_v58, %v213_v53  ;;  %v5283_v61 = vpop.f32.mrb[5].mxu1  ;;  %v5634_v15 = vld [vmem:[#allocation8 + $0x5ec] ss:$28 sps:$4 sm:$0xff]  }
 0x19b   :  { %3285 = vmatpush1.bf16.msra.mxu0 %v5602_v21  ;;  %3457 = vmatpush1.bf16.msra.mxu1 %v5605_v23  ;;  %v711_v40 = vsel %vm683_vm9, %v630_v24, %v697_v34  ;;  %vm690_vm11 = vcmp.gt.f32.partialorder %v634_v35, 0.0  ;;  %v704_v41 = vmul.f32 0.01, %v634_v35  ;;  %v675_v2 = vpop.f32.mrb[6].mxu1  ;;  %v5640_v23 = vld [vmem:[#allocation8 + $0x624] ss:$28 sps:$4 sm:$0xff]  }
 0x19c   :  { %3286 = vmatprep.subr.bf16.mxu0 %v5610_v26  ;;  %3458 = vmatprep.subr.bf16.mxu1 %v5613_v27  ;;  %v712_v44 = vsel %vm684_vm10, %v632_v29, %v698_v37  ;;  %vm691_vm12 = vcmp.gt.f32.partialorder %v636_v38, 0.0  ;;  %v705_v45 = vmul.f32 0.01, %v636_v38  ;;  %vm685_vm13 = vcmp.gt.f32.partialorder %v673_v60, 0.0  ;;  %v5284_v9 = vpop.f32.mrb[7].mxu1 }
 0x19d   :  { %v718_v49 = vsel %vm690_vm11, %v634_v35, %v704_v41  ;;  %v699_v8 = vmul.f32 0.01, %v673_v60  ;;  %v676_v5 = vadd.f32 %v675_v2, %v213_v53  ;;  %v5643_v24 = vld [vmem:[#allocation8 + $0x62c] ss:$28 sps:$4 sm:$0xff]   ;;  %v5638_v25 = vld [vmem:[#allocation8 + $0x620] ss:$28 sps:$4 sm:$0xff]  }
 0x19e   :  { %v6478_v50 = vpack.c.bf16 %v718_v49, %v711_v40  ;;  %v719_v51 = vsel %vm691_vm12, %v636_v38, %v705_v45  ;;  %v5641_v26 = vld [vmem:[#allocation8 + $0x628] ss:$28 sps:$4 sm:$0xff]   ;;  %v5646_v27 = vld [vmem:[#allocation8 + $0x65c] ss:$28 sps:$4 sm:$0xff]   ;;  %v5650_v35 = vld [vmem:[#allocation8 + $0x690] ss:$28 sps:$4 sm:$0xff]  }
 0x19f   :  { %3287 = vmatpush1.bf16.msra.mxu0 %v5608_v32  ;;  %3459 = vmatpush1.bf16.msra.mxu1 %v5611_v33  ;;  %v6480_v52 = vpack.c.bf16 %v719_v51, %v712_v44  ;;  %v713_v13 = vsel %vm685_vm13, %v673_v60, %v699_v8  ;;  %vm692_vm14 = vcmp.gt.f32.partialorder %v676_v5, 0.0  ;;  %v706_v14 = vmul.f32 0.01, %v676_v5  ;;  %v5649_v29 = vld [vmem:[#allocation8 + $0x664] ss:$28 sps:$4 sm:$0xff]  }
 0x1a0   :  { %3288 = vmatprep.subr.bf16.mxu0 %v5616_v39  ;;  %3460 = vmatprep.subr.bf16.mxu1 %v5619_v43  ;;  %v5644_v31 = vld [vmem:[#allocation8 + $0x658] ss:$28 sps:$4 sm:$0xff]   ;;  %v5647_v32 = vld [vmem:[#allocation8 + $0x660] ss:$28 sps:$4 sm:$0xff]   ;;  %v5658_v37 = vld [vmem:[#allocation8 + $0x6cc] ss:$28 sps:$4 sm:$0xff]  }
 0x1a1   :  { %v720_v18 = vsel %vm692_vm14, %v676_v5, %v706_v14  ;;  %v5652_v33 = vld [vmem:[#allocation8 + $0x694] ss:$28 sps:$4 sm:$0xff]   ;;  %v5655_v34 = vld [vmem:[#allocation8 + $0x69c] ss:$28 sps:$4 sm:$0xff]   ;;  %v5656_v39 = vld [vmem:[#allocation8 + $0x6c8] ss:$28 sps:$4 sm:$0xff]  }
 0x1a2   :  { %v6485_v21 = vpack.c.bf16 %v720_v18, %v713_v13  ;;  %v5653_v36 = vld [vmem:[#allocation8 + $0x698] ss:$28 sps:$4 sm:$0xff]   ;;  %v5659_v40 = vld [vmem:[#allocation8 + $0x6d0] ss:$28 sps:$4 sm:$0xff]   ;;  %v5664_v41 = vld [vmem:[#allocation8 + $0x704] ss:$28 sps:$4 sm:$0xff]  }
 0x1a3   :  { %3289 = vmatpush1.bf16.msra.mxu0 %v5614_v47  ;;  %3461 = vmatpush1.bf16.msra.mxu1 %v5617_v48  ;;  %v5661_v38 = vld [vmem:[#allocation8 + $0x6d4] ss:$28 sps:$4 sm:$0xff]   ;;  %v5667_v43 = vld [vmem:[#allocation8 + $0x70c] ss:$28 sps:$4 sm:$0xff]   ;;  %v5662_v44 = vld [vmem:[#allocation8 + $0x700] ss:$28 sps:$4 sm:$0xff]  }
 0x1a4   :  { %3290 = vmatprep.subr.bf16.mxu0 %v5622_v54  ;;  %3462 = vmatprep.subr.bf16.mxu1 %v5625_v55  ;;  %v5665_v45 = vld [vmem:[#allocation8 + $0x708] ss:$28 sps:$4 sm:$0xff]   ;;  %v5670_v47 = vld [vmem:[#allocation8 + $0x73c] ss:$28 sps:$4 sm:$0xff]   ;;  %v5676_v53 = vld [vmem:[#allocation8 + $0x774] ss:$28 sps:$4 sm:$0xff]  }
 0x1a5   :  { %v5673_v48 = vld [vmem:[#allocation8 + $0x744] ss:$28 sps:$4 sm:$0xff]   ;;  %v5668_v49 = vld [vmem:[#allocation8 + $0x738] ss:$28 sps:$4 sm:$0xff]   ;;  %v5674_v55 = vld [vmem:[#allocation8 + $0x770] ss:$28 sps:$4 sm:$0xff]  }
 0x1a6   :  { %v5671_v51 = vld [vmem:[#allocation8 + $0x740] ss:$28 sps:$4 sm:$0xff]   ;;  %v5685_v58 = vld [vmem:[#allocation8 + $0x7b4] ss:$28 sps:$4 sm:$0xff]   ;;  %v5680_v60 = vld [vmem:[#allocation8 + $0x7a8] ss:$28 sps:$4 sm:$0xff]  }
 0x1a7   :  { %3291 = vmatpush1.bf16.msra.mxu0 %v5620_v56  ;;  %3463 = vmatpush1.bf16.msra.mxu1 %v5623_v57  ;;  %v5679_v54 = vld [vmem:[#allocation8 + $0x77c] ss:$28 sps:$4 sm:$0xff]   ;;  %v5682_v57 = vld [vmem:[#allocation8 + $0x7ac] ss:$28 sps:$4 sm:$0xff]   ;;  %v5697_v5 = vld [vmem:[#allocation8 + $0x824] ss:$28 sps:$4 sm:$0xff]  }
 0x1a8   :  { %3292 = vmatprep.subr.bf16.mxu0 %v5628_v62  ;;  %3464 = vmatprep.subr.bf16.mxu1 %v5631_v1  ;;  %v5677_v56 = vld [vmem:[#allocation8 + $0x778] ss:$28 sps:$4 sm:$0xff]   ;;  %v5683_v61 = vld [vmem:[#allocation8 + $0x7b0] ss:$28 sps:$4 sm:$0xff]   ;;  %v5688_v62 = vld [vmem:[#allocation8 + $0x7e4] ss:$28 sps:$4 sm:$0xff]  }
 0x1a9   :  { %v5691_v1 = vld [vmem:[#allocation8 + $0x7ec] ss:$28 sps:$4 sm:$0xff]   ;;  %v5686_v2 = vld [vmem:[#allocation8 + $0x7e0] ss:$28 sps:$4 sm:$0xff]   ;;  %v5692_v9 = vld [vmem:[#allocation8 + $0x818] ss:$28 sps:$4 sm:$0xff]  }
 0x1aa   :  { %v5694_v8 = vld [vmem:[#allocation8 + $0x81c] ss:$28 sps:$4 sm:$0xff]   ;;  %v5700_v13 = vld [vmem:[#allocation8 + $0x854] ss:$28 sps:$4 sm:$0xff]  }
 0x1ab   :  { %3293 = vmatpush1.bf16.msra.mxu0 %v5626_v7  ;;  %3465 = vmatpush1.bf16.msra.mxu1 %v5629_v11  ;;  %v5689_v7 = vld [vmem:[#allocation8 + $0x7e8] ss:$28 sps:$4 sm:$0xff]   ;;  %v5695_v11 = vld [vmem:[#allocation8 + $0x820] ss:$28 sps:$4 sm:$0xff]   ;;  %v5709_v18 = vld [vmem:[#allocation8 + $0x894] ss:$28 sps:$4 sm:$0xff]  }
 0x1ac   :  { %3294 = vmatprep.subr.bf16.mxu0 %v5634_v15  ;;  %3466 = vmatprep.subr.bf16.mxu1 %v5637_v16  ;;  %v5703_v14 = vld [vmem:[#allocation8 + $0x85c] ss:$28 sps:$4 sm:$0xff]   ;;  %v5698_v15 = vld [vmem:[#allocation8 + $0x850] ss:$28 sps:$4 sm:$0xff]  }
 0x1ad   :  { %v5701_v16 = vld [vmem:[#allocation8 + $0x858] ss:$28 sps:$4 sm:$0xff]  }
 0x1af   :  { %3295 = vmatpush1.bf16.msra.mxu0 %v5632_v17  ;;  %3467 = vmatpush1.bf16.msra.mxu1 %v5635_v19  ;;  %v5706_v17 = vld [vmem:[#allocation8 + $0x88c] ss:$28 sps:$4 sm:$0xff]  }
 0x1b0   :  { %3296 = vmatprep.subr.bf16.mxu0 %v5640_v23  ;;  %3468 = vmatprep.subr.bf16.mxu1 %v5643_v24  ;;  %v5704_v19 = vld [vmem:[#allocation8 + $0x888] ss:$28 sps:$4 sm:$0xff]   ;;  %v5707_v23 = vld [vmem:[#allocation8 + $0x890] ss:$28 sps:$4 sm:$0xff]  }
 0x1b1   :  { %v5712_v24 = vld [vmem:[#allocation8 + $0x8c4] ss:$28 sps:$4 sm:$0xff]  }
 0x1b3   :  { %3297 = vmatpush1.bf16.msra.mxu0 %v5638_v25  ;;  %3469 = vmatpush1.bf16.msra.mxu1 %v5641_v26  ;;  %v5715_v25 = vld [vmem:[#allocation8 + $0x8cc] ss:$28 sps:$4 sm:$0xff]   ;;  %v5710_v26 = vld [vmem:[#allocation8 + $0x8c0] ss:$28 sps:$4 sm:$0xff]  }
 0x1b4   :  { %3298 = vmatprep.subr.bf16.mxu0 %v5646_v27  ;;  %3470 = vmatprep.subr.bf16.mxu1 %v5649_v29  ;;  %v5713_v27 = vld [vmem:[#allocation8 + $0x8c8] ss:$28 sps:$4 sm:$0xff]   ;;  %v5718_v29 = vld [vmem:[#allocation8 + $0x8fc] ss:$28 sps:$4 sm:$0xff]  }
 0x1b7   :  { %3299 = vmatpush1.bf16.msra.mxu0 %v5644_v31  ;;  %3471 = vmatpush1.bf16.msra.mxu1 %v5647_v32  ;;  %v5721_v31 = vld [vmem:[#allocation8 + $0x904] ss:$28 sps:$4 sm:$0xff]   ;;  %v5716_v32 = vld [vmem:[#allocation8 + $0x8f8] ss:$28 sps:$4 sm:$0xff]  }
 0x1b8   :  { %3300 = vmatprep.subr.bf16.mxu0 %v5652_v33  ;;  %3472 = vmatprep.subr.bf16.mxu1 %v5655_v34  ;;  %v5719_v33 = vld [vmem:[#allocation8 + $0x900] ss:$28 sps:$4 sm:$0xff]   ;;  %v5724_v34 = vld [vmem:[#allocation8 + $0x934] ss:$28 sps:$4 sm:$0xff]  }
 0x1bb   :  { %3301 = vmatpush1.bf16.msra.mxu0 %v5650_v35  ;;  %3473 = vmatpush1.bf16.msra.mxu1 %v5653_v36  ;;  %v5727_v35 = vld [vmem:[#allocation8 + $0x93c] ss:$28 sps:$4 sm:$0xff]   ;;  %v5722_v36 = vld [vmem:[#allocation8 + $0x930] ss:$28 sps:$4 sm:$0xff]  }
 0x1bc   :  { %3302 = vmatprep.subr.bf16.mxu0 %v5658_v37  ;;  %3474 = vmatprep.subr.bf16.mxu1 %v5661_v38  ;;  %v5725_v37 = vld [vmem:[#allocation8 + $0x938] ss:$28 sps:$4 sm:$0xff]   ;;  %v5730_v38 = vld [vmem:[#allocation8 + $0x96c] ss:$28 sps:$4 sm:$0xff]  }
 0x1bf   :  { %3303 = vmatpush1.bf16.msra.mxu0 %v5656_v39  ;;  %3475 = vmatpush1.bf16.msra.mxu1 %v5659_v40  ;;  %v5733_v39 = vld [vmem:[#allocation8 + $0x974] ss:$28 sps:$4 sm:$0xff]   ;;  %v5728_v40 = vld [vmem:[#allocation8 + $0x968] ss:$28 sps:$4 sm:$0xff]  }
 0x1c0   :  { %3315 = vmatprep.subr.bf16.mxu0 %v5664_v41  ;;  %3487 = vmatprep.subr.bf16.mxu1 %v5667_v43  ;;  %v5731_v41 = vld [vmem:[#allocation8 + $0x970] ss:$28 sps:$4 sm:$0xff]   ;;  %v5736_v43 = vld [vmem:[#allocation8 + $0x9a4] ss:$28 sps:$4 sm:$0xff]  }
 0x1c2   :  { %3305 = vmatmul.mubr.bf16.vlgmr.msra.gmra.mrb[8].mxu0 %v6463_v59  ;;  %3477 = vmatmul.mubr.bf16.vlgmr.msra.gmra.mrb[8].mxu1 %v6463_v59 }
 0x1c3   :  { %3316 = vmatpush1.bf16.msra.mxu0 %v5662_v44  ;;  %3488 = vmatpush1.bf16.msra.mxu1 %v5665_v45  ;;  %v5739_v44 = vld [vmem:[#allocation8 + $0x9ac] ss:$28 sps:$4 sm:$0xff]   ;;  %v5734_v45 = vld [vmem:[#allocation8 + $0x9a0] ss:$28 sps:$4 sm:$0xff]  }
 0x1c4   :  { %3317 = vmatprep.subr.bf16.mxu0 %v5670_v47  ;;  %3489 = vmatprep.subr.bf16.mxu1 %v5673_v48  ;;  %v5737_v47 = vld [vmem:[#allocation8 + $0x9a8] ss:$28 sps:$4 sm:$0xff]   ;;  %v5742_v48 = vld [vmem:[#allocation8 + $0x9dc] ss:$28 sps:$4 sm:$0xff]  }
 0x1c5   :  { %3347 = vmatprep.mubr.bf16.mxu0 %v6480_v52  ;;  %3519 = vmatprep.mubr.bf16.mxu1 %v6480_v52 }
 0x1c7   :  { %3318 = vmatpush1.bf16.msra.mxu0 %v5668_v49  ;;  %3490 = vmatpush1.bf16.msra.mxu1 %v5671_v51  ;;  %v5745_v49 = vld [vmem:[#allocation8 + $0x9e4] ss:$28 sps:$4 sm:$0xff]   ;;  %v5740_v51 = vld [vmem:[#allocation8 + $0x9d8] ss:$28 sps:$4 sm:$0xff]  }
 0x1c8   :  { %3319 = vmatprep.subr.bf16.mxu0 %v5676_v53  ;;  %3491 = vmatprep.subr.bf16.mxu1 %v5679_v54  ;;  %v5743_v53 = vld [vmem:[#allocation8 + $0x9e0] ss:$28 sps:$4 sm:$0xff]   ;;  %v5748_v54 = vld [vmem:[#allocation8 + $0xa14] ss:$28 sps:$4 sm:$0xff]  }
 0x1cb   :  { %3320 = vmatpush1.bf16.msra.mxu0 %v5674_v55  ;;  %3492 = vmatpush1.bf16.msra.mxu1 %v5677_v56  ;;  %v5751_v55 = vld [vmem:[#allocation8 + $0xa1c] ss:$28 sps:$4 sm:$0xff]   ;;  %v5746_v56 = vld [vmem:[#allocation8 + $0xa10] ss:$28 sps:$4 sm:$0xff]  }
 0x1cc   :  { %3321 = vmatprep.subr.bf16.mxu0 %v5682_v57  ;;  %3493 = vmatprep.subr.bf16.mxu1 %v5685_v58  ;;  %v5749_v57 = vld [vmem:[#allocation8 + $0xa18] ss:$28 sps:$4 sm:$0xff]   ;;  %v5754_v58 = vld [vmem:[#allocation8 + $0xa4c] ss:$28 sps:$4 sm:$0xff]  }
 0x1cf   :  { %3322 = vmatpush1.bf16.msra.mxu0 %v5680_v60  ;;  %3494 = vmatpush1.bf16.msra.mxu1 %v5683_v61  ;;  %v5757_v60 = vld [vmem:[#allocation8 + $0xa54] ss:$28 sps:$4 sm:$0xff]   ;;  %v5752_v61 = vld [vmem:[#allocation8 + $0xa48] ss:$28 sps:$4 sm:$0xff]  }
 0x1d0   :  { %3323 = vmatprep.subr.bf16.mxu0 %v5688_v62  ;;  %3495 = vmatprep.subr.bf16.mxu1 %v5691_v1  ;;  %v5755_v62 = vld [vmem:[#allocation8 + $0xa50] ss:$28 sps:$4 sm:$0xff]   ;;  %v5760_v1 = vld [vmem:[#allocation8 + $0xa84] ss:$28 sps:$4 sm:$0xff]  }
 0x1d3   :  { %3324 = vmatpush1.bf16.msra.mxu0 %v5686_v2  ;;  %3496 = vmatpush1.bf16.msra.mxu1 %v5689_v7  ;;  %v5763_v2 = vld [vmem:[#allocation8 + $0xa8c] ss:$28 sps:$4 sm:$0xff]   ;;  %v5758_v7 = vld [vmem:[#allocation8 + $0xa80] ss:$28 sps:$4 sm:$0xff]  }
 0x1d4   :  { %3325 = vmatprep.subr.bf16.mxu0 %v5694_v8  ;;  %3497 = vmatprep.subr.bf16.mxu1 %v5697_v5  ;;  %v5761_v8 = vld [vmem:[#allocation8 + $0xa88] ss:$28 sps:$4 sm:$0xff]   ;;  %v5766_v5 = vld [vmem:[#allocation8 + $0xabc] ss:$28 sps:$4 sm:$0xff]  }
 0x1d7   :  { %3326 = vmatpush1.bf16.msra.mxu0 %v5692_v9  ;;  %3498 = vmatpush1.bf16.msra.mxu1 %v5695_v11  ;;  %v5769_v9 = vld [vmem:[#allocation8 + $0xac4] ss:$28 sps:$4 sm:$0xff]   ;;  %v5764_v11 = vld [vmem:[#allocation8 + $0xab8] ss:$28 sps:$4 sm:$0xff]  }
 0x1d8   :  { %3327 = vmatprep.subr.bf16.mxu0 %v5700_v13  ;;  %3499 = vmatprep.subr.bf16.mxu1 %v5703_v14  ;;  %v5767_v13 = vld [vmem:[#allocation8 + $0xac0] ss:$28 sps:$4 sm:$0xff]   ;;  %v5772_v14 = vld [vmem:[#allocation8 + $0xaf4] ss:$28 sps:$4 sm:$0xff]  }
 0x1db   :  { %3328 = vmatpush1.bf16.msra.mxu0 %v5698_v15  ;;  %3500 = vmatpush1.bf16.msra.mxu1 %v5701_v16  ;;  %v5775_v15 = vld [vmem:[#allocation8 + $0xafc] ss:$28 sps:$4 sm:$0xff]   ;;  %v5770_v16 = vld [vmem:[#allocation8 + $0xaf0] ss:$28 sps:$4 sm:$0xff]  }
 0x1dc   :  { %3329 = vmatprep.subr.bf16.mxu0 %v5706_v17  ;;  %3501 = vmatprep.subr.bf16.mxu1 %v5709_v18  ;;  %v5773_v17 = vld [vmem:[#allocation8 + $0xaf8] ss:$28 sps:$4 sm:$0xff]   ;;  %v5778_v18 = vld [vmem:[#allocation8 + $0xb2c] ss:$28 sps:$4 sm:$0xff]  }
 0x1df   :  { %3330 = vmatpush1.bf16.msra.mxu0 %v5704_v19  ;;  %3502 = vmatpush1.bf16.msra.mxu1 %v5707_v23  ;;  %v5781_v19 = vld [vmem:[#allocation8 + $0xb34] ss:$28 sps:$4 sm:$0xff]   ;;  %v5776_v23 = vld [vmem:[#allocation8 + $0xb28] ss:$28 sps:$4 sm:$0xff]  }
 0x1e0   :  { %3331 = vmatprep.subr.bf16.mxu0 %v5712_v24  ;;  %3503 = vmatprep.subr.bf16.mxu1 %v5715_v25  ;;  %v5779_v24 = vld [vmem:[#allocation8 + $0xb30] ss:$28 sps:$4 sm:$0xff]   ;;  %v5784_v25 = vld [vmem:[#allocation8 + $0xb64] ss:$28 sps:$4 sm:$0xff]  }
 0x1e3   :  { %3332 = vmatpush1.bf16.msra.mxu0 %v5710_v26  ;;  %3504 = vmatpush1.bf16.msra.mxu1 %v5713_v27  ;;  %v5787_v26 = vld [vmem:[#allocation8 + $0xb6c] ss:$28 sps:$4 sm:$0xff]   ;;  %v5782_v27 = vld [vmem:[#allocation8 + $0xb60] ss:$28 sps:$4 sm:$0xff]  }
 0x1e4   :  { %3333 = vmatprep.subr.bf16.mxu0 %v5718_v29  ;;  %3505 = vmatprep.subr.bf16.mxu1 %v5721_v31  ;;  %v5785_v29 = vld [vmem:[#allocation8 + $0xb68] ss:$28 sps:$4 sm:$0xff]   ;;  %v5790_v31 = vld [vmem:[#allocation8 + $0xb9c] ss:$28 sps:$4 sm:$0xff]  }
 0x1e7   :  { %3334 = vmatpush1.bf16.msra.mxu0 %v5716_v32  ;;  %3506 = vmatpush1.bf16.msra.mxu1 %v5719_v33  ;;  %v5793_v32 = vld [vmem:[#allocation8 + $0xba4] ss:$28 sps:$4 sm:$0xff]   ;;  %v5788_v33 = vld [vmem:[#allocation8 + $0xb98] ss:$28 sps:$4 sm:$0xff]  }
 0x1e8   :  { %3335 = vmatprep.subr.bf16.mxu0 %v5724_v34  ;;  %3507 = vmatprep.subr.bf16.mxu1 %v5727_v35  ;;  %v5791_v34 = vld [vmem:[#allocation8 + $0xba0] ss:$28 sps:$4 sm:$0xff]   ;;  %v5796_v35 = vld [vmem:[#allocation8 + $0xbd4] ss:$28 sps:$4 sm:$0xff]  }
 0x1eb   :  { %3336 = vmatpush1.bf16.msra.mxu0 %v5722_v36  ;;  %3508 = vmatpush1.bf16.msra.mxu1 %v5725_v37  ;;  %v5799_v36 = vld [vmem:[#allocation8 + $0xbdc] ss:$28 sps:$4 sm:$0xff]   ;;  %v5794_v37 = vld [vmem:[#allocation8 + $0xbd0] ss:$28 sps:$4 sm:$0xff]  }
 0x1ec   :  { %3337 = vmatprep.subr.bf16.mxu0 %v5730_v38  ;;  %3509 = vmatprep.subr.bf16.mxu1 %v5733_v39  ;;  %v5797_v38 = vld [vmem:[#allocation8 + $0xbd8] ss:$28 sps:$4 sm:$0xff]   ;;  %v5802_v39 = vld [vmem:[#allocation8 + $0xc0c] ss:$28 sps:$4 sm:$0xff]  }
 0x1ef   :  { %3338 = vmatpush1.bf16.msra.mxu0 %v5728_v40  ;;  %3510 = vmatpush1.bf16.msra.mxu1 %v5731_v41  ;;  %v5805_v40 = vld [vmem:[#allocation8 + $0xc14] ss:$28 sps:$4 sm:$0xff]   ;;  %v5800_v41 = vld [vmem:[#allocation8 + $0xc08] ss:$28 sps:$4 sm:$0xff]  }
 0x1f0   :  { %3339 = vmatprep.subr.bf16.mxu0 %v5736_v43  ;;  %3511 = vmatprep.subr.bf16.mxu1 %v5739_v44  ;;  %v5803_v43 = vld [vmem:[#allocation8 + $0xc10] ss:$28 sps:$4 sm:$0xff]  }
 0x1f1   :  { %v5808_v44 = vld [vmem:[#allocation8 + $0x14] ss:$28 sps:$4 sm:$0xff]  }
 0x1f3   :  { %3340 = vmatpush1.bf16.msra.mxu0 %v5734_v45  ;;  %3512 = vmatpush1.bf16.msra.mxu1 %v5737_v47  ;;  %v5809_v45 = vld [vmem:[#allocation8 + $0x1d8] ss:$28 sps:$4 sm:$0xff]   ;;  %v5806_v47 = vld [vmem:[#allocation8 + $0x10] ss:$28 sps:$4 sm:$0xff]  }
 0x1f4   :  { %3341 = vmatprep.subr.bf16.mxu0 %v5742_v48  ;;  %3513 = vmatprep.subr.bf16.mxu1 %v5745_v49  ;;  %v5810_v48 = vld [vmem:[#allocation8 + $0x18] ss:$28 sps:$4 sm:$0xff]   ;;  %v5813_v49 = vld [vmem:[#allocation8 + $0x4c] ss:$28 sps:$4 sm:$0xff]  }
 0x1f7   :  { %3342 = vmatpush1.bf16.msra.mxu0 %v5740_v51  ;;  %3514 = vmatpush1.bf16.msra.mxu1 %v5743_v53  ;;  %v5814_v51 = vld [vmem:[#allocation8 + $0x210] ss:$28 sps:$4 sm:$0xff]   ;;  %v5811_v53 = vld [vmem:[#allocation8 + $0x48] ss:$28 sps:$4 sm:$0xff]  }
 0x1f8   :  { %3343 = vmatprep.subr.bf16.mxu0 %v5748_v54  ;;  %3515 = vmatprep.subr.bf16.mxu1 %v5751_v55  ;;  %v5815_v54 = vld [vmem:[#allocation8 + $0x50] ss:$28 sps:$4 sm:$0xff]   ;;  %v5818_v55 = vld [vmem:[#allocation8 + $0x84] ss:$28 sps:$4 sm:$0xff]  }
 0x1fb   :  { %3344 = vmatpush1.bf16.msra.mxu0 %v5746_v56  ;;  %3516 = vmatpush1.bf16.msra.mxu1 %v5749_v57  ;;  %v5819_v56 = vld [vmem:[#allocation8 + $0x248] ss:$28 sps:$4 sm:$0xff]   ;;  %v5816_v57 = vld [vmem:[#allocation8 + $0x80] ss:$28 sps:$4 sm:$0xff]  }
 0x1fc   :  { %3345 = vmatprep.subr.bf16.mxu0 %v5754_v58  ;;  %3517 = vmatprep.subr.bf16.mxu1 %v5757_v60  ;;  %v5820_v58 = vld [vmem:[#allocation8 + $0x88] ss:$28 sps:$4 sm:$0xff]   ;;  %v5823_v60 = vld [vmem:[#allocation8 + $0xbc] ss:$28 sps:$4 sm:$0xff]  }
 0x1ff   :  { %3346 = vmatpush1.bf16.msra.mxu0 %v5752_v61  ;;  %3518 = vmatpush1.bf16.msra.mxu1 %v5755_v62  ;;  %v5824_v61 = vld [vmem:[#allocation8 + $0x280] ss:$28 sps:$4 sm:$0xff]   ;;  %v5821_v62 = vld [vmem:[#allocation8 + $0xb8] ss:$28 sps:$4 sm:$0xff]  }
 0x200   :  { %3358 = vmatprep.subr.bf16.mxu0 %v5760_v1  ;;  %3530 = vmatprep.subr.bf16.mxu1 %v5763_v2  ;;  %v5825_v1 = vld [vmem:[#allocation8 + $0xc0] ss:$28 sps:$4 sm:$0xff]   ;;  %v5828_v2 = vld [vmem:[#allocation8 + $0xf4] ss:$28 sps:$4 sm:$0xff]  }
 0x202   :  { %3348 = vmatmul.mubr.bf16.vlgmr.msra.gmra.mrb[8].mxu0 %v6478_v50  ;;  %3520 = vmatmul.mubr.bf16.vlgmr.msra.gmra.mrb[8].mxu1 %v6478_v50 }
 0x203   :  { %3359 = vmatpush1.bf16.msra.mxu0 %v5758_v7  ;;  %3531 = vmatpush1.bf16.msra.mxu1 %v5761_v8  ;;  %v5826_v7 = vld [vmem:[#allocation8 + $0xf0] ss:$28 sps:$4 sm:$0xff]   ;;  %v5830_v8 = vld [vmem:[#allocation8 + $0xf8] ss:$28 sps:$4 sm:$0xff]  }
 0x204   :  { %3360 = vmatprep.subr.bf16.mxu0 %v5766_v5  ;;  %3532 = vmatprep.subr.bf16.mxu1 %v5769_v9  ;;  %v5833_v5 = vld [vmem:[#allocation8 + $0x12c] ss:$28 sps:$4 sm:$0xff]  }
 0x205   :  { %3390 = vmatprep.mubr.bf16.mxu0 %v6285_v0  ;;  %3562 = vmatprep.mubr.bf16.mxu1 %v6285_v0  ;;  %v5834_v9 = vld [vmem:[#allocation8 + $0x2f0] ss:$28 sps:$4 sm:$0xff]  }
 0x207   :  { %3361 = vmatpush1.bf16.msra.mxu0 %v5764_v11  ;;  %3533 = vmatpush1.bf16.msra.mxu1 %v5767_v13  ;;  %v5831_v11 = vld [vmem:[#allocation8 + $0x128] ss:$28 sps:$4 sm:$0xff]   ;;  %v5835_v13 = vld [vmem:[#allocation8 + $0x130] ss:$28 sps:$4 sm:$0xff]  }
 0x208   :  { %3362 = vmatprep.subr.bf16.mxu0 %v5772_v14  ;;  %3534 = vmatprep.subr.bf16.mxu1 %v5775_v15  ;;  %v5838_v14 = vld [vmem:[#allocation8 + $0x164] ss:$28 sps:$4 sm:$0xff]  }
 0x209   :  { %v5839_v15 = vld [vmem:[#allocation8 + $0x328] ss:$28 sps:$4 sm:$0xff]  }
 0x20b   :  { %3363 = vmatpush1.bf16.msra.mxu0 %v5770_v16  ;;  %3535 = vmatpush1.bf16.msra.mxu1 %v5773_v17  ;;  %v5836_v16 = vld [vmem:[#allocation8 + $0x160] ss:$28 sps:$4 sm:$0xff]   ;;  %v5840_v17 = vld [vmem:[#allocation8 + $0x168] ss:$28 sps:$4 sm:$0xff]  }
 0x20c   :  { %3364 = vmatprep.subr.bf16.mxu0 %v5778_v18  ;;  %3536 = vmatprep.subr.bf16.mxu1 %v5781_v19  ;;  %v5843_v18 = vld [vmem:[#allocation8 + $0x19c] ss:$28 sps:$4 sm:$0xff]  }
 0x20d   :  { %v5844_v19 = vld [vmem:[#allocation8 + $0x360] ss:$28 sps:$4 sm:$0xff]  }
 0x20f   :  { %3365 = vmatpush1.bf16.msra.mxu0 %v5776_v23  ;;  %3537 = vmatpush1.bf16.msra.mxu1 %v5779_v24  ;;  %v5841_v23 = vld [vmem:[#allocation8 + $0x198] ss:$28 sps:$4 sm:$0xff]   ;;  %v5845_v24 = vld [vmem:[#allocation8 + $0x1a0] ss:$28 sps:$4 sm:$0xff]  }
 0x210   :  { %3366 = vmatprep.subr.bf16.mxu0 %v5784_v25  ;;  %3538 = vmatprep.subr.bf16.mxu1 %v5787_v26  ;;  %v5848_v25 = vld [vmem:[#allocation8 + $0x1d4] ss:$28 sps:$4 sm:$0xff]  }
 0x211   :  { %v5849_v26 = vld [vmem:[#allocation8 + $0x558] ss:$28 sps:$4 sm:$0xff]  }
 0x213   :  { %3367 = vmatpush1.bf16.msra.mxu0 %v5782_v27  ;;  %3539 = vmatpush1.bf16.msra.mxu1 %v5785_v29  ;;  %v5846_v27 = vld [vmem:[#allocation8 + $0x1d0] ss:$28 sps:$4 sm:$0xff]   ;;  %v5850_v29 = vld [vmem:[#allocation8 + $0x398] ss:$28 sps:$4 sm:$0xff]  }
 0x214   :  { %3368 = vmatprep.subr.bf16.mxu0 %v5790_v31  ;;  %3540 = vmatprep.subr.bf16.mxu1 %v5793_v32  ;;  %v5853_v31 = vld [vmem:[#allocation8 + $0x20c] ss:$28 sps:$4 sm:$0xff]  }
 0x215   :  { %v5854_v32 = vld [vmem:[#allocation8 + $0x590] ss:$28 sps:$4 sm:$0xff]  }
 0x217   :  { %3369 = vmatpush1.bf16.msra.mxu0 %v5788_v33  ;;  %3541 = vmatpush1.bf16.msra.mxu1 %v5791_v34  ;;  %v5851_v33 = vld [vmem:[#allocation8 + $0x208] ss:$28 sps:$4 sm:$0xff]   ;;  %v5855_v34 = vld [vmem:[#allocation8 + $0x3d0] ss:$28 sps:$4 sm:$0xff]  }
 0x218   :  { %3370 = vmatprep.subr.bf16.mxu0 %v5796_v35  ;;  %3542 = vmatprep.subr.bf16.mxu1 %v5799_v36  ;;  %v5858_v35 = vld [vmem:[#allocation8 + $0x244] ss:$28 sps:$4 sm:$0xff]  }
 0x219   :  { %v5859_v36 = vld [vmem:[#allocation8 + $0x5c8] ss:$28 sps:$4 sm:$0xff]  }
 0x21b   :  { %3371 = vmatpush1.bf16.msra.mxu0 %v5794_v37  ;;  %3543 = vmatpush1.bf16.msra.mxu1 %v5797_v38  ;;  %v5856_v37 = vld [vmem:[#allocation8 + $0x240] ss:$28 sps:$4 sm:$0xff]   ;;  %v5860_v38 = vld [vmem:[#allocation8 + $0x408] ss:$28 sps:$4 sm:$0xff]  }
 0x21c   :  { %3372 = vmatprep.subr.bf16.mxu0 %v5802_v39  ;;  %3544 = vmatprep.subr.bf16.mxu1 %v5805_v40  ;;  %v5863_v39 = vld [vmem:[#allocation8 + $0x27c] ss:$28 sps:$4 sm:$0xff]  }
 0x21d   :  { %v5864_v40 = vld [vmem:[#allocation8 + $0x600] ss:$28 sps:$4 sm:$0xff]  }
 0x21f   :  { %3373 = vmatpush1.bf16.msra.mxu0 %v5800_v41  ;;  %3545 = vmatpush1.bf16.msra.mxu1 %v5803_v43  ;;  %v5861_v41 = vld [vmem:[#allocation8 + $0x278] ss:$28 sps:$4 sm:$0xff]   ;;  %v5865_v43 = vld [vmem:[#allocation8 + $0x440] ss:$28 sps:$4 sm:$0xff]  }
 0x220   :  { %3573 = vmatprep.subr.bf16.mxu0 %v5808_v44  ;;  %5115 = vmatprep.subr.bf16.mxu1 %v5809_v45  ;;  %v5868_v44 = vld [vmem:[#allocation8 + $0x2b4] ss:$28 sps:$4 sm:$0xff]  }
 0x221   :  { %v5869_v45 = vld [vmem:[#allocation8 + $0x638] ss:$28 sps:$4 sm:$0xff]  }
 0x222   :  { %3391 = vmatmul.mubr.bf16.vlgmr.msra.gmra.mrb[8].mxu0 %v6485_v21  ;;  %3563 = vmatmul.mubr.bf16.vlgmr.msra.gmra.mrb[8].mxu1 %v6485_v21 }
 0x223   :  { %3574 = vmatpush1.bf16.msra.mxu0 %v5806_v47  ;;  %3605 = vmatprep.mubr.bf16.mxu0 %v6451_v30  ;;  %v5866_v47 = vld [vmem:[#allocation8 + $0x2b0] ss:$28 sps:$4 sm:$0xff]  }
 0x224   :  { %5116 = vmatpush3.bf16.msra.mxu1 %v5810_v48  ;;  %3777 = vmatprep.mubr.bf16.mxu1 %v6451_v30  ;;  %v5829_v30 = vld [vmem:[#allocation8 + $0x2b8] ss:$28 sps:$4 sm:$0xff]  }
 0x225   :  { %3575 = vmatprep.subr.bf16.mxu0 %v5813_v49  ;;  %5117 = vmatprep.subr.bf16.mxu1 %v5814_v51  ;;  %v5870_v48 = vld [vmem:[#allocation8 + $0x478] ss:$28 sps:$4 sm:$0xff]   ;;  %v5873_v49 = vld [vmem:[#allocation8 + $0x2ec] ss:$28 sps:$4 sm:$0xff]  }
 0x226   :  { %v5874_v51 = vld [vmem:[#allocation8 + $0x670] ss:$28 sps:$4 sm:$0xff]  }
 0x227   :  { %3576 = vmatpush1.bf16.msra.mxu0 %v5811_v53  ;;  %v5871_v53 = vld [vmem:[#allocation8 + $0x2e8] ss:$28 sps:$4 sm:$0xff]  }
 0x228   :  { %5118 = vmatpush3.bf16.msra.mxu1 %v5815_v54  ;;  %3577 = vmatprep.subr.bf16.mxu0 %v5818_v55  ;;  %v5875_v54 = vld [vmem:[#allocation8 + $0x4b0] ss:$28 sps:$4 sm:$0xff]   ;;  %v5878_v55 = vld [vmem:[#allocation8 + $0x324] ss:$28 sps:$4 sm:$0xff]  }
 0x229   :  { %5119 = vmatprep.subr.bf16.mxu1 %v5819_v56  ;;  %v5879_v56 = vld [vmem:[#allocation8 + $0x6a8] ss:$28 sps:$4 sm:$0xff]  }
 0x22b   :  { %3578 = vmatpush1.bf16.msra.mxu0 %v5816_v57  ;;  %v5876_v57 = vld [vmem:[#allocation8 + $0x320] ss:$28 sps:$4 sm:$0xff]  }
 0x22c   :  { %5120 = vmatpush3.bf16.msra.mxu1 %v5820_v58  ;;  %3579 = vmatprep.subr.bf16.mxu0 %v5823_v60  ;;  %v5880_v58 = vld [vmem:[#allocation8 + $0x4e8] ss:$28 sps:$4 sm:$0xff]   ;;  %v5883_v60 = vld [vmem:[#allocation8 + $0x35c] ss:$28 sps:$4 sm:$0xff]  }
 0x22d   :  { %5121 = vmatprep.subr.bf16.mxu1 %v5824_v61  ;;  %v5884_v61 = vld [vmem:[#allocation8 + $0x6e0] ss:$28 sps:$4 sm:$0xff]  }
 0x22f   :  { %3580 = vmatpush1.bf16.msra.mxu0 %v5821_v62  ;;  %v5881_v62 = vld [vmem:[#allocation8 + $0x358] ss:$28 sps:$4 sm:$0xff]  }
 0x230   :  { %5122 = vmatpush3.bf16.msra.mxu1 %v5825_v1  ;;  %3581 = vmatprep.subr.bf16.mxu0 %v5828_v2  ;;  %v5885_v1 = vld [vmem:[#allocation8 + $0x520] ss:$28 sps:$4 sm:$0xff]   ;;  %v5888_v2 = vld [vmem:[#allocation8 + $0x394] ss:$28 sps:$4 sm:$0xff]  }
 0x231   :  { %5123 = vmatprep.subr.bf16.mxu1 %v5829_v30  ;;  %v5889_v30 = vld [vmem:[#allocation8 + $0x8d8] ss:$28 sps:$4 sm:$0xff]  }
 0x233   :  { %3582 = vmatpush1.bf16.msra.mxu0 %v5826_v7  ;;  %v5886_v7 = vld [vmem:[#allocation8 + $0x390] ss:$28 sps:$4 sm:$0xff]  }
 0x234   :  { %5124 = vmatpush3.bf16.msra.mxu1 %v5830_v8  ;;  %3583 = vmatprep.subr.bf16.mxu0 %v5833_v5  ;;  %v5890_v8 = vld [vmem:[#allocation8 + $0x718] ss:$28 sps:$4 sm:$0xff]   ;;  %v5893_v5 = vld [vmem:[#allocation8 + $0x3cc] ss:$28 sps:$4 sm:$0xff]  }
 0x235   :  { %5125 = vmatprep.subr.bf16.mxu1 %v5834_v9  ;;  %v5894_v9 = vld [vmem:[#allocation8 + $0x910] ss:$28 sps:$4 sm:$0xff]  }
 0x237   :  { %3584 = vmatpush1.bf16.msra.mxu0 %v5831_v11  ;;  %v5891_v11 = vld [vmem:[#allocation8 + $0x3c8] ss:$28 sps:$4 sm:$0xff]  }
 0x238   :  { %5126 = vmatpush3.bf16.msra.mxu1 %v5835_v13  ;;  %3585 = vmatprep.subr.bf16.mxu0 %v5838_v14  ;;  %v5895_v13 = vld [vmem:[#allocation8 + $0x750] ss:$28 sps:$4 sm:$0xff]   ;;  %v5898_v14 = vld [vmem:[#allocation8 + $0x404] ss:$28 sps:$4 sm:$0xff]  }
 0x239   :  { %5127 = vmatprep.subr.bf16.mxu1 %v5839_v15  ;;  %v5899_v15 = vld [vmem:[#allocation8 + $0x948] ss:$28 sps:$4 sm:$0xff]  }
 0x23b   :  { %3586 = vmatpush1.bf16.msra.mxu0 %v5836_v16  ;;  %v5896_v16 = vld [vmem:[#allocation8 + $0x400] ss:$28 sps:$4 sm:$0xff]  }
 0x23c   :  { %5128 = vmatpush3.bf16.msra.mxu1 %v5840_v17  ;;  %3587 = vmatprep.subr.bf16.mxu0 %v5843_v18  ;;  %v5903_v17 = vld [vmem:[#allocation8 + $0x43c] ss:$28 sps:$4 sm:$0xff]  }
 0x23d   :  { %5129 = vmatprep.subr.bf16.mxu1 %v5844_v19  ;;  %v5904_v18 = vld [vmem:[#allocation8 + $0x980] ss:$28 sps:$4 sm:$0xff]   ;;  %v5901_v19 = vld [vmem:[#allocation8 + $0x438] ss:$28 sps:$4 sm:$0xff]  }
 0x23f   :  { %3588 = vmatpush1.bf16.msra.mxu0 %v5841_v23  ;;  %v5908_v23 = vld [vmem:[#allocation8 + $0x474] ss:$28 sps:$4 sm:$0xff]  }
 0x240   :  { %5130 = vmatpush3.bf16.msra.mxu1 %v5845_v24  ;;  %3589 = vmatprep.subr.bf16.mxu0 %v5848_v25  ;;  %v5909_v24 = vld [vmem:[#allocation8 + $0x9b8] ss:$28 sps:$4 sm:$0xff]   ;;  %v5906_v25 = vld [vmem:[#allocation8 + $0x470] ss:$28 sps:$4 sm:$0xff]  }
 0x241   :  { %5137 = vmatprep.subr.bf16.mxu1 %v5849_v26  ;;  %v5910_v26 = vld [vmem:[#allocation8 + $0x7f8] ss:$28 sps:$4 sm:$0xff]  }
 0x243   :  { %3778 = vmatmul.mubr.bf16.vlgmr.msra.gmra.mrb[12].mxu1 %v6449_v28  ;;  %3590 = vmatpush1.bf16.msra.mxu0 %v5846_v27  ;;  %v5913_v27 = vld [vmem:[#allocation8 + $0x4ac] ss:$28 sps:$4 sm:$0xff]  }
 0x244   :  { %5138 = vmatpush3.bf16.msra.mxu1 %v5850_v29  ;;  %3818 = vmatprep.mubr.bf16.mxu1 %v6465_v63  ;;  %v5914_v29 = vld [vmem:[#allocation8 + $0x9f0] ss:$28 sps:$4 sm:$0xff]  }
 0x245   :  { %3591 = vmatprep.subr.bf16.mxu0 %v5853_v31  ;;  %5139 = vmatprep.subr.bf16.mxu1 %v5854_v32  ;;  %v5911_v31 = vld [vmem:[#allocation8 + $0x4a8] ss:$28 sps:$4 sm:$0xff]   ;;  %v5915_v32 = vld [vmem:[#allocation8 + $0x830] ss:$28 sps:$4 sm:$0xff]  }
 0x247   :  { %3592 = vmatpush1.bf16.msra.mxu0 %v5851_v33  ;;  %v5918_v33 = vld [vmem:[#allocation8 + $0x4e4] ss:$28 sps:$4 sm:$0xff]  }
 0x248   :  { %5140 = vmatpush3.bf16.msra.mxu1 %v5855_v34  ;;  %3593 = vmatprep.subr.bf16.mxu0 %v5858_v35  ;;  %v5919_v34 = vld [vmem:[#allocation8 + $0xa28] ss:$28 sps:$4 sm:$0xff]   ;;  %v5916_v35 = vld [vmem:[#allocation8 + $0x4e0] ss:$28 sps:$4 sm:$0xff]  }
 0x249   :  { %5141 = vmatprep.subr.bf16.mxu1 %v5859_v36  ;;  %v5920_v36 = vld [vmem:[#allocation8 + $0x868] ss:$28 sps:$4 sm:$0xff]  }
 0x24b   :  { %3594 = vmatpush1.bf16.msra.mxu0 %v5856_v37  ;;  %v5923_v37 = vld [vmem:[#allocation8 + $0x51c] ss:$28 sps:$4 sm:$0xff]  }
 0x24c   :  { %5142 = vmatpush3.bf16.msra.mxu1 %v5860_v38  ;;  %3595 = vmatprep.subr.bf16.mxu0 %v5863_v39  ;;  %v5924_v38 = vld [vmem:[#allocation8 + $0xa60] ss:$28 sps:$4 sm:$0xff]   ;;  %v5921_v39 = vld [vmem:[#allocation8 + $0x518] ss:$28 sps:$4 sm:$0xff]  }
 0x24d   :  { %5143 = vmatprep.subr.bf16.mxu1 %v5864_v40  ;;  %v5925_v40 = vld [vmem:[#allocation8 + $0x8a0] ss:$28 sps:$4 sm:$0xff]  }
 0x24f   :  { %3596 = vmatpush1.bf16.msra.mxu0 %v5861_v41  ;;  %v5928_v41 = vld [vmem:[#allocation8 + $0x554] ss:$28 sps:$4 sm:$0xff]  }
 0x250   :  { %5144 = vmatpush3.bf16.msra.mxu1 %v5865_v43  ;;  %3597 = vmatprep.subr.bf16.mxu0 %v5868_v44  ;;  %v5926_v43 = vld [vmem:[#allocation8 + $0x550] ss:$28 sps:$4 sm:$0xff]   ;;  %v5929_v44 = vld [vmem:[#allocation8 + $0xa98] ss:$28 sps:$4 sm:$0xff]  }
 0x251   :  { %5145 = vmatprep.subr.bf16.mxu1 %v5869_v45  ;;  %v5932_v45 = vld [vmem:[#allocation8 + $0x58c] ss:$28 sps:$4 sm:$0xff]  }
 0x253   :  { %3598 = vmatpush1.bf16.msra.mxu0 %v5866_v47  ;;  %v5930_v47 = vld [vmem:[#allocation8 + $0x588] ss:$28 sps:$4 sm:$0xff]  }
 0x254   :  { %5146 = vmatpush3.bf16.msra.mxu1 %v5870_v48  ;;  %3599 = vmatprep.subr.bf16.mxu0 %v5873_v49  ;;  %v5933_v48 = vld [vmem:[#allocation8 + $0xad0] ss:$28 sps:$4 sm:$0xff]   ;;  %v5936_v49 = vld [vmem:[#allocation8 + $0x5c4] ss:$28 sps:$4 sm:$0xff]  }
 0x255   :  { %5147 = vmatprep.subr.bf16.mxu1 %v5874_v51  ;;  %v5934_v51 = vld [vmem:[#allocation8 + $0x5c0] ss:$28 sps:$4 sm:$0xff]  }
 0x257   :  { %3600 = vmatpush1.bf16.msra.mxu0 %v5871_v53  ;;  %v5937_v53 = vld [vmem:[#allocation8 + $0xb08] ss:$28 sps:$4 sm:$0xff]  }
 0x258   :  { %5148 = vmatpush3.bf16.msra.mxu1 %v5875_v54  ;;  %3601 = vmatprep.subr.bf16.mxu0 %v5878_v55  ;;  %v5940_v54 = vld [vmem:[#allocation8 + $0x5fc] ss:$28 sps:$4 sm:$0xff]  }
 0x259   :  { %5149 = vmatprep.subr.bf16.mxu1 %v5879_v56  ;;  %v5938_v55 = vld [vmem:[#allocation8 + $0x5f8] ss:$28 sps:$4 sm:$0xff]   ;;  %v5941_v56 = vld [vmem:[#allocation8 + $0xb40] ss:$28 sps:$4 sm:$0xff]  }
 0x25b   :  { %3602 = vmatpush1.bf16.msra.mxu0 %v5876_v57  ;;  %v5944_v57 = vld [vmem:[#allocation8 + $0x634] ss:$28 sps:$4 sm:$0xff]  }
 0x25c   :  { %5150 = vmatpush3.bf16.msra.mxu1 %v5880_v58  ;;  %3603 = vmatprep.subr.bf16.mxu0 %v5883_v60  ;;  %v5942_v58 = vld [vmem:[#allocation8 + $0x630] ss:$28 sps:$4 sm:$0xff]   ;;  %v5945_v60 = vld [vmem:[#allocation8 + $0xb78] ss:$28 sps:$4 sm:$0xff]  }
 0x25d   :  { %5151 = vmatprep.subr.bf16.mxu1 %v5884_v61  ;;  %v5948_v61 = vld [vmem:[#allocation8 + $0x66c] ss:$28 sps:$4 sm:$0xff]  }
 0x25f   :  { %3604 = vmatpush1.bf16.msra.mxu0 %v5881_v62  ;;  %v5946_v62 = vld [vmem:[#allocation8 + $0x668] ss:$28 sps:$4 sm:$0xff]  }
 0x260   :  { %5152 = vmatpush3.bf16.msra.mxu1 %v5885_v1  ;;  %3616 = vmatprep.subr.bf16.mxu0 %v5888_v2  ;;  %v5949_v1 = vld [vmem:[#allocation8 + $0xbb0] ss:$28 sps:$4 sm:$0xff]   ;;  %v5952_v2 = vld [vmem:[#allocation8 + $0x6a4] ss:$28 sps:$4 sm:$0xff]  }
 0x261   :  { %5159 = vmatprep.subr.bf16.mxu1 %v5889_v30  ;;  %v5950_v30 = vld [vmem:[#allocation8 + $0x6a0] ss:$28 sps:$4 sm:$0xff]  }
 0x262   :  { %3606 = vmatmul.mubr.bf16.vlgmr.msra.gmra.mrb[12].mxu0 %v6449_v28  ;;  %v5900_v28 = vld [vmem:[#allocation8 + $0x788] ss:$28 sps:$4 sm:$0xff]  }
 0x263   :  { %3819 = vmatmul.mubr.bf16.vlgmr.msra.gmra.mrb[16].mxu1 %v6463_v59  ;;  %3617 = vmatpush1.bf16.msra.mxu0 %v5886_v7  ;;  %v5953_v7 = vld [vmem:[#allocation8 + $0xbe8] ss:$28 sps:$4 sm:$0xff]  }
 0x264   :  { %3648 = vmatprep.mubr.bf16.mxu0 %v6465_v63  ;;  %5160 = vmatpush3.bf16.msra.mxu1 %v5890_v8  ;;  %v5905_v63 = vld [vmem:[#allocation8 + $0x7c0] ss:$28 sps:$4 sm:$0xff]  }
 0x265   :  { %3859 = vmatprep.mubr.bf16.mxu1 %v6480_v52  ;;  %3618 = vmatprep.subr.bf16.mxu0 %v5893_v5  ;;  %v5956_v8 = vld [vmem:[#allocation8 + $0x6dc] ss:$28 sps:$4 sm:$0xff]  }
 0x266   :  { %5161 = vmatprep.subr.bf16.mxu1 %v5894_v9  ;;  %v5954_v5 = vld [vmem:[#allocation8 + $0x6d8] ss:$28 sps:$4 sm:$0xff]   ;;  %v5957_v9 = vld [vmem:[#allocation8 + $0xc20] ss:$28 sps:$4 sm:$0xff]  }
 0x267   :  { %3619 = vmatpush1.bf16.msra.mxu0 %v5891_v11  ;;  %v5960_v11 = vld [vmem:[#allocation8 + $0x714] ss:$28 sps:$4 sm:$0xff]  }
 0x268   :  { %5162 = vmatpush3.bf16.msra.mxu1 %v5895_v13  ;;  %3620 = vmatprep.subr.bf16.mxu0 %v5898_v14  ;;  %v6006_v13 = vld [vmem:[#allocation11 + $0x40] sm:$0xff]  }
 0x269   :  { %5163 = vmatprep.subr.bf16.mxu1 %v5899_v15  ;;  %v5958_v14 = vld [vmem:[#allocation8 + $0x710] ss:$28 sps:$4 sm:$0xff]  }
 0x26a   :  { %v5963_v15 = vld [vmem:[#allocation8 + $0x74c] ss:$28 sps:$4 sm:$0xff]  }
 0x26b   :  { %3621 = vmatpush1.bf16.msra.mxu0 %v5896_v16  ;;  %v6007_v16 = vld [vmem:[#allocation11] sm:$0xff]  }
 0x26c   :  { %5164 = vmatpush3.bf16.msra.mxu1 %v5900_v28  ;;  %3622 = vmatprep.subr.bf16.mxu0 %v5903_v17  ;;  %v6011_v28 = vld [vmem:[#allocation11 + $0x48] sm:$0xff]   ;;  %v5961_v17 = vld [vmem:[#allocation8 + $0x748] ss:$28 sps:$4 sm:$0xff]  }
 0x26d   :  { %5165 = vmatprep.subr.bf16.mxu1 %v5904_v18  ;;  %v5966_v18 = vld [vmem:[#allocation8 + $0x784] ss:$28 sps:$4 sm:$0xff]  }
 0x26f   :  { %3623 = vmatpush1.bf16.msra.mxu0 %v5901_v19  ;;  %v6012_v19 = vld [vmem:[#allocation11 + $0x8] sm:$0xff]  }
 0x270   :  { %5166 = vmatpush3.bf16.msra.mxu1 %v5905_v63  ;;  %3624 = vmatprep.subr.bf16.mxu0 %v5908_v23  ;;  %v6016_v63 = vld [vmem:[#allocation11 + $0x50] sm:$0xff]  }
 0x271   :  { %5167 = vmatprep.subr.bf16.mxu1 %v5909_v24  ;;  %v5964_v23 = vld [vmem:[#allocation8 + $0x780] ss:$28 sps:$4 sm:$0xff]  }
 0x272   :  { %v5969_v24 = vld [vmem:[#allocation8 + $0x7bc] ss:$28 sps:$4 sm:$0xff]  }
 0x273   :  { %3625 = vmatpush1.bf16.msra.mxu0 %v5906_v25  ;;  %v6017_v25 = vld [vmem:[#allocation11 + $0x10] sm:$0xff]  }
 0x274   :  { %5168 = vmatpush3.bf16.msra.mxu1 %v5910_v26  ;;  %3626 = vmatprep.subr.bf16.mxu0 %v5913_v27  ;;  %v5967_v26 = vld [vmem:[#allocation8 + $0x7b8] ss:$28 sps:$4 sm:$0xff]  }
 0x275   :  { %5169 = vmatprep.subr.bf16.mxu1 %v5914_v29  ;;  %v5972_v27 = vld [vmem:[#allocation8 + $0x7f4] ss:$28 sps:$4 sm:$0xff]   ;;  %v6026_v29 = vld [vmem:[#allocation11 + $0x60] sm:$0xff]  }
 0x277   :  { %3627 = vmatpush1.bf16.msra.mxu0 %v5911_v31  ;;  %v5970_v31 = vld [vmem:[#allocation8 + $0x7f0] ss:$28 sps:$4 sm:$0xff]  }
 0x278   :  { %5170 = vmatpush3.bf16.msra.mxu1 %v5915_v32  ;;  %3628 = vmatprep.subr.bf16.mxu0 %v5918_v33  ;;  %v5975_v32 = vld [vmem:[#allocation8 + $0x82c] ss:$28 sps:$4 sm:$0xff]  }
 0x279   :  { %5171 = vmatprep.subr.bf16.mxu1 %v5919_v34  ;;  %v6027_v33 = vld [vmem:[#allocation11 + $0x20] sm:$0xff]   ;;  %v6031_v34 = vld [vmem:[#allocation11 + $0x68] sm:$0xff]  }
 0x27b   :  { %3629 = vmatpush1.bf16.msra.mxu0 %v5916_v35  ;;  %v5973_v35 = vld [vmem:[#allocation8 + $0x828] ss:$28 sps:$4 sm:$0xff]  }
 0x27c   :  { %5172 = vmatpush3.bf16.msra.mxu1 %v5920_v36  ;;  %3630 = vmatprep.subr.bf16.mxu0 %v5923_v37  ;;  %v5978_v36 = vld [vmem:[#allocation8 + $0x864] ss:$28 sps:$4 sm:$0xff]   ;;  %v6032_v37 = vld [vmem:[#allocation11 + $0x28] sm:$0xff]  }
 0x27d   :  { %5173 = vmatprep.subr.bf16.mxu1 %v5924_v38  ;;  %v6036_v38 = vld [vmem:[#allocation11 + $0x70] sm:$0xff]  }
 0x27f   :  { %3631 = vmatpush1.bf16.msra.mxu0 %v5921_v39  ;;  %v5976_v39 = vld [vmem:[#allocation8 + $0x860] ss:$28 sps:$4 sm:$0xff]  }
 0x280   :  { %5174 = vmatpush3.bf16.msra.mxu1 %v5925_v40  ;;  %3632 = vmatprep.subr.bf16.mxu0 %v5928_v41  ;;  %v5981_v40 = vld [vmem:[#allocation8 + $0x89c] ss:$28 sps:$4 sm:$0xff]  }
 0x281   :  { %5285 = vmatprep.subr.bf16.mxu1 %v6286_v46  ;;  %v6037_v41 = vld [vmem:[#allocation11 + $0x30] sm:$0xff]  }
 0x283   :  { %3860 = vmatmul.mubr.bf16.vlgmr.msra.gmra.mrb[20].mxu1 %v6478_v50  ;;  %3633 = vmatpush1.bf16.msra.mxu0 %v5926_v43  ;;  %v6041_v43 = vld [vmem:[#allocation11 + $0x78] sm:$0xff]  }
 0x284   :  { %5286 = vmatpush3.bf16.msra.mxu1 %v5929_v44  ;;  %3634 = vmatprep.subr.bf16.mxu0 %v5932_v45  ;;  %v5979_v44 = vld [vmem:[#allocation8 + $0x898] ss:$28 sps:$4 sm:$0xff]  }
 0x285   :  { %5287 = vmatprep.subr.bf16.mxu1 %v6286_v46  ;;  %5301 = vmatprep.mubr.msk.bf16.mxu1 %vm6287_vm0, %v6286_v46  ;;  %v5984_v45 = vld [vmem:[#allocation8 + $0x8d4] ss:$28 sps:$4 sm:$0xff]  }
 0x287   :  { %3635 = vmatpush1.bf16.msra.mxu0 %v5930_v47  ;;  %v6042_v47 = vld [vmem:[#allocation11 + $0x38] sm:$0xff]  }
 0x288   :  { %5288 = vmatpush3.bf16.msra.mxu1 %v5933_v48  ;;  %3636 = vmatprep.subr.bf16.mxu0 %v5936_v49  ;;  %v6046_v48 = vld [vmem:[#allocation11 + $0xc0] sm:$0xff]  }
 0x289   :  { %5289 = vmatprep.subr.bf16.mxu1 %v6286_v46  ;;  %v5982_v49 = vld [vmem:[#allocation8 + $0x8d0] ss:$28 sps:$4 sm:$0xff]  }
 0x28b   :  { %3637 = vmatpush1.bf16.msra.mxu0 %v5934_v51  ;;  %v5987_v51 = vld [vmem:[#allocation8 + $0x90c] ss:$28 sps:$4 sm:$0xff]  }
 0x28c   :  { %5290 = vmatpush3.bf16.msra.mxu1 %v5937_v53  ;;  %3638 = vmatprep.subr.bf16.mxu0 %v5940_v54  ;;  %v5985_v53 = vld [vmem:[#allocation8 + $0x908] ss:$28 sps:$4 sm:$0xff]  }
 0x28d   :  { %5291 = vmatprep.subr.bf16.mxu1 %v6286_v46  ;;  %v5990_v54 = vld [vmem:[#allocation8 + $0x944] ss:$28 sps:$4 sm:$0xff]  }
 0x28f   :  { %3639 = vmatpush1.bf16.msra.mxu0 %v5938_v55  ;;  %v5988_v55 = vld [vmem:[#allocation8 + $0x940] ss:$28 sps:$4 sm:$0xff]  }
 0x290   :  { %5292 = vmatpush3.bf16.msra.mxu1 %v5941_v56  ;;  %3640 = vmatprep.subr.bf16.mxu0 %v5944_v57  ;;  %v5993_v56 = vld [vmem:[#allocation8 + $0x97c] ss:$28 sps:$4 sm:$0xff]  }
 0x291   :  { %5293 = vmatprep.subr.bf16.mxu1 %v6286_v46  ;;  %v5991_v57 = vld [vmem:[#allocation8 + $0x978] ss:$28 sps:$4 sm:$0xff]  }
 0x293   :  { %3641 = vmatpush1.bf16.msra.mxu0 %v5942_v58  ;;  %v5996_v58 = vld [vmem:[#allocation8 + $0x9b4] ss:$28 sps:$4 sm:$0xff]  }
 0x294   :  { %5294 = vmatpush3.bf16.msra.mxu1 %v5945_v60  ;;  %3642 = vmatprep.subr.bf16.mxu0 %v5948_v61  ;;  %v5994_v60 = vld [vmem:[#allocation8 + $0x9b0] ss:$28 sps:$4 sm:$0xff]  }
 0x295   :  { %5295 = vmatprep.subr.bf16.mxu1 %v6286_v46  ;;  %v5999_v61 = vld [vmem:[#allocation8 + $0x9ec] ss:$28 sps:$4 sm:$0xff]  }
 0x297   :  { %3643 = vmatpush1.bf16.msra.mxu0 %v5946_v62  ;;  %v5997_v62 = vld [vmem:[#allocation8 + $0x9e8] ss:$28 sps:$4 sm:$0xff]  }
 0x298   :  { %5296 = vmatpush3.bf16.msra.mxu1 %v5949_v1  ;;  %3644 = vmatprep.subr.bf16.mxu0 %v5952_v2  ;;  %v6002_v1 = vld [vmem:[#allocation8 + $0xa24] ss:$28 sps:$4 sm:$0xff]  }
 0x299   :  { %5297 = vmatprep.subr.bf16.mxu1 %v6286_v46  ;;  %v6000_v2 = vld [vmem:[#allocation8 + $0xa20] ss:$28 sps:$4 sm:$0xff]  }
 0x29b   :  { %3645 = vmatpush1.bf16.msra.mxu0 %v5950_v30  ;;  %v6005_v30 = vld [vmem:[#allocation8 + $0xa5c] ss:$28 sps:$4 sm:$0xff]  }
 0x29c   :  { %5298 = vmatpush3.bf16.msra.mxu1 %v5953_v7  ;;  %3646 = vmatprep.subr.bf16.mxu0 %v5956_v8  ;;  %v6003_v7 = vld [vmem:[#allocation8 + $0xa58] ss:$28 sps:$4 sm:$0xff]  }
 0x29d   :  { %5299 = vmatprep.subr.bf16.mxu1 %v6286_v46  ;;  %v6010_v8 = vld [vmem:[#allocation8 + $0xa94] ss:$28 sps:$4 sm:$0xff]  }
 0x29f   :  { %3647 = vmatpush1.bf16.msra.mxu0 %v5954_v5  ;;  %v6008_v5 = vld [vmem:[#allocation8 + $0xa90] ss:$28 sps:$4 sm:$0xff]  }
 0x2a0   :  { %5300 = vmatpush3.bf16.msra.mxu1 %v5957_v9  ;;  %3659 = vmatprep.subr.bf16.mxu0 %v5960_v11  ;;  %v6015_v9 = vld [vmem:[#allocation8 + $0xacc] ss:$28 sps:$4 sm:$0xff]  }
 0x2a1   :  { %5190 = vmatprep.subr.bf16.mxu1 %v6006_v13  ;;  %v6013_v11 = vld [vmem:[#allocation8 + $0xac8] ss:$28 sps:$4 sm:$0xff]  }
 0x2a2   :  { %3649 = vmatmul.mubr.bf16.vlgmr.msra.gmra.mrb[12].mxu0 %v6463_v59  ;;  %v6021_v59 = vld [vmem:[#allocation11 + $0x58] sm:$0xff]  }
 0x2a3   :  { %5302 = vmatmul.mubr.bf16.vlgmr.msra.gmra.mrb[24].mxu1 %v6485_v21  ;;  %3660 = vmatpush1.bf16.msra.mxu0 %v5958_v14  ;;  %v6020_v13 = vld [vmem:[#allocation8 + $0xb04] ss:$28 sps:$4 sm:$0xff]  }
 0x2a4   :  { %3691 = vmatprep.mubr.bf16.mxu0 %v6480_v52  ;;  %3661 = vmatprep.subr.bf16.mxu0 %v5963_v15  ;;  %v6022_v52 = vld [vmem:[#allocation11 + $0x18] sm:$0xff]   ;;  %v6025_v15 = vld [vmem:[#allocation8 + $0xb3c] ss:$28 sps:$4 sm:$0xff]  }
 0x2a5   :  { %5191 = vmatpush3.bf16.msra.mxu1 %v6007_v16  ;;  %v6018_v14 = vld [vmem:[#allocation8 + $0xb00] ss:$28 sps:$4 sm:$0xff]   ;;  %v6023_v16 = vld [vmem:[#allocation8 + $0xb38] ss:$28 sps:$4 sm:$0xff]  }
 0x2a6   :  { %5192 = vmatprep.subr.bf16.mxu1 %v6011_v28  ;;  %v6030_v28 = vld [vmem:[#allocation8 + $0xb74] ss:$28 sps:$4 sm:$0xff]  }
 0x2a7   :  { %3662 = vmatpush1.bf16.msra.mxu0 %v5961_v17  ;;  %v6028_v17 = vld [vmem:[#allocation8 + $0xb70] ss:$28 sps:$4 sm:$0xff]  }
 0x2a8   :  { %3663 = vmatprep.subr.bf16.mxu0 %v5966_v18  ;;  %v6521_v18 = vld [vmem:[#allocation10] sm:$0xff] }
 0x2a9   :  { %5193 = vmatpush3.bf16.msra.mxu1 %v6012_v19  ;;  %v1189_v19 = vrot.slane %v6521_v18, %v196_v20 }
 0x2aa   :  { %5194 = vmatprep.subr.bf16.mxu1 %v6016_v63  ;;  %v1185_v63 = vrot.slane %v6521_v18, %v192_v6  ;;  %v6045_v6 = vld [vmem:[#allocation8 + $0xc1c] ss:$28 sps:$4 sm:$0xff]  }
 0x2ab   :  { %3664 = vmatpush1.bf16.msra.mxu0 %v5964_v23  ;;  %v1193_v23 = vrot.slane %v6521_v18, %v200_v22 }
 0x2ac   :  { %3665 = vmatprep.subr.bf16.mxu0 %v5969_v24  ;;  %v6033_v24 = vld [vmem:[#allocation8 + $0xba8] ss:$28 sps:$4 sm:$0xff]  }
 0x2ad   :  { %5195 = vmatpush3.bf16.msra.mxu1 %v6017_v25  ;;  %v6040_v25 = vld [vmem:[#allocation8 + $0xbe4] ss:$28 sps:$4 sm:$0xff]  }
 0x2ae   :  { %5196 = vmatprep.subr.bf16.mxu1 %v6021_v59 }
 0x2af   :  { %3666 = vmatpush1.bf16.msra.mxu0 %v5967_v26 }
 0x2b0   :  { %3667 = vmatprep.subr.bf16.mxu0 %v5972_v27 }
 0x2b1   :  { %5197 = vmatpush3.bf16.msra.mxu1 %v6022_v52 }
 0x2b2   :  { %5198 = vmatprep.subr.bf16.mxu1 %v6026_v29 }
 0x2b3   :  { %3668 = vmatpush1.bf16.msra.mxu0 %v5970_v31 }
 0x2b4   :  { %3669 = vmatprep.subr.bf16.mxu0 %v5975_v32 }
 0x2b5   :  { %5199 = vmatpush3.bf16.msra.mxu1 %v6027_v33 }
 0x2b6   :  { %5200 = vmatprep.subr.bf16.mxu1 %v6031_v34  ;;  %v6038_v34 = vld [vmem:[#allocation8 + $0xbe0] ss:$28 sps:$4 sm:$0xff]  }
 0x2b7   :  { %3670 = vmatpush1.bf16.msra.mxu0 %v5973_v35 }
 0x2b8   :  { %3671 = vmatprep.subr.bf16.mxu0 %v5978_v36 }
 0x2b9   :  { %5201 = vmatpush3.bf16.msra.mxu1 %v6032_v37 }
 0x2ba   :  { %5202 = vmatprep.subr.bf16.mxu1 %v6036_v38 }
 0x2bb   :  { %3672 = vmatpush1.bf16.msra.mxu0 %v5976_v39 }
 0x2bc   :  { %3673 = vmatprep.subr.bf16.mxu0 %v5981_v40 }
 0x2bd   :  { %5203 = vmatpush3.bf16.msra.mxu1 %v6037_v41 }
 0x2be   :  { %5204 = vmatprep.subr.bf16.mxu1 %v6041_v43 }
 0x2bf   :  { %3674 = vmatpush1.bf16.msra.mxu0 %v5979_v44 }
 0x2c0   :  { %3675 = vmatprep.subr.bf16.mxu0 %v5984_v45 }
 0x2c1   :  { %5205 = vmatpush3.bf16.msra.mxu1 %v6042_v47 }
 0x2c2   :  { %5212 = vmatprep.subr.bf16.mxu1 %v6046_v48  ;;  %v6043_v48 = vld [vmem:[#allocation8 + $0xc18] ss:$28 sps:$4 sm:$0xff]  }
 0x2c3   :  { %3676 = vmatpush1.bf16.msra.mxu0 %v5982_v49 }
 0x2c4   :  { %3677 = vmatprep.subr.bf16.mxu0 %v5987_v51 }
 0x2c7   :  { %3678 = vmatpush1.bf16.msra.mxu0 %v5985_v53 }
 0x2c8   :  { %3679 = vmatprep.subr.bf16.mxu0 %v5990_v54 }
 0x2cb   :  { %3680 = vmatpush1.bf16.msra.mxu0 %v5988_v55 }
 0x2cc   :  { %3681 = vmatprep.subr.bf16.mxu0 %v5993_v56 }
 0x2cf   :  { %3682 = vmatpush1.bf16.msra.mxu0 %v5991_v57 }
 0x2d0   :  { %3683 = vmatprep.subr.bf16.mxu0 %v5996_v58 }
 0x2d3   :  { %3684 = vmatpush1.bf16.msra.mxu0 %v5994_v60 }
 0x2d4   :  { %3685 = vmatprep.subr.bf16.mxu0 %v5999_v61 }
 0x2d7   :  { %3686 = vmatpush1.bf16.msra.mxu0 %v5997_v62 }
 0x2d8   :  { %3687 = vmatprep.subr.bf16.mxu0 %v6002_v1 }
 0x2db   :  { %3688 = vmatpush1.bf16.msra.mxu0 %v6000_v2  ;;  %v6062_v2 = vld [vmem:[#allocation11 + $0x180] sm:$0xff]  }
 0x2dc   :  { %3689 = vmatprep.subr.bf16.mxu0 %v6005_v30 }
 0x2df   :  { %3690 = vmatpush1.bf16.msra.mxu0 %v6003_v7  ;;  %v6047_v7 = vld [vmem:[#allocation11 + $0x80] sm:$0xff]  }
 0x2e0   :  { %3702 = vmatprep.subr.bf16.mxu0 %v6010_v8 }
 0x2e2   :  { %3692 = vmatmul.mubr.bf16.vlgmr.msra.gmra.mrb[12].mxu0 %v6478_v50  ;;  %v6035_v50 = vld [vmem:[#allocation8 + $0xbac] ss:$28 sps:$4 sm:$0xff]  }
 0x2e3   :  { %3703 = vmatpush1.bf16.msra.mxu0 %v6008_v5  ;;  %3734 = vmatprep.mubr.bf16.mxu0 %v6285_v0  ;;  %v1181_v0 = vrot.slane %v6521_v18, %v188_v4  ;;  %v6048_v5 = vld [vmem:[#allocation11 + $0xc8] sm:$0xff]  }
 0x2e4   :  { %3704 = vmatprep.subr.bf16.mxu0 %v6015_v9  ;;  %v6063_v9 = vld [vmem:[#allocation11 + $0x188] sm:$0xff]  }
 0x2e7   :  { %3705 = vmatpush1.bf16.msra.mxu0 %v6013_v11  ;;  %v6049_v11 = vld [vmem:[#allocation11 + $0x88] sm:$0xff]  }
 0x2e8   :  { %3706 = vmatprep.subr.bf16.mxu0 %v6020_v13  ;;  %v6050_v13 = vld [vmem:[#allocation11 + $0xd0] sm:$0xff]  }
 0x2eb   :  { %3707 = vmatpush1.bf16.msra.mxu0 %v6018_v14  ;;  %v6064_v14 = vld [vmem:[#allocation11 + $0x190] sm:$0xff]  }
 0x2ec   :  { %3708 = vmatprep.subr.bf16.mxu0 %v6025_v15  ;;  %v6051_v15 = vld [vmem:[#allocation11 + $0x90] sm:$0xff]  }
 0x2ef   :  { %3709 = vmatpush1.bf16.msra.mxu0 %v6023_v16  ;;  %v6065_v16 = vld [vmem:[#allocation11 + $0x198] sm:$0xff]  }
 0x2f0   :  { %3710 = vmatprep.subr.bf16.mxu0 %v6030_v28  ;;  %v6053_v28 = vld [vmem:[#allocation11 + $0x98] sm:$0xff]  }
 0x2f3   :  { %3711 = vmatpush1.bf16.msra.mxu0 %v6028_v17  ;;  %v6054_v17 = vld [vmem:[#allocation11 + $0xe0] sm:$0xff]  }
 0x2f4   :  { %3712 = vmatprep.subr.bf16.mxu0 %v6035_v50  ;;  %v6066_v50 = vld [vmem:[#allocation11 + $0x1a0] sm:$0xff]  }
 0x2f5   :  { %v3392_v59 = vpop.f32.mrb[8].mxu0  ;;  %v3564_v26 = vpop.f32.mrb[8].mxu1 }
 0x2f6   :  { %v5325_v27 = vadd.f32 %v3392_v59, %v1181_v0  ;;  %v5329_v4 = vadd.f32 %v3564_v26, %v1189_v19  ;;  %v3394_v52 = vpop.f32.mrb[9].mxu0  ;;  %v3566_v29 = vpop.f32.mrb[9].mxu1  ;;  %v6068_v26 = vld [vmem:[#allocation11 + $0x1b0] sm:$0xff]  }
 0x2f7   :  { %v5326_v31 = vadd.f32 %v3394_v52, %v1185_v63  ;;  %v5330_v20 = vadd.f32 %v3566_v29, %v1193_v23  ;;  %v3396_v32 = vpop.f32.mrb[10].mxu0  ;;  %v3568_v33 = vpop.f32.mrb[10].mxu1  ;;  %3713 = vmatpush1.bf16.msra.mxu0 %v6033_v24  ;;  %v6058_v24 = vld [vmem:[#allocation11 + $0xf0] sm:$0xff]  }
 0x2f8   :  { %vm3909_vm15 = vcmp.gt.f32.partialorder %v5325_v27, 0.0  ;;  %v3923_v35 = vmul.f32 0.01, %v5325_v27  ;;  %vm3911_vm1 = vcmp.gt.f32.partialorder %v5329_v4, 0.0  ;;  %v3925_v22 = vmul.f32 0.01, %v5329_v4  ;;  %3714 = vmatprep.subr.bf16.mxu0 %v6040_v25 }
 0x2f9   :  { %vm3910_vm2 = vcmp.gt.f32.partialorder %v5326_v31, 0.0  ;;  %v3924_v36 = vmul.f32 0.01, %v5326_v31  ;;  %vm3912_vm3 = vcmp.gt.f32.partialorder %v5330_v20, 0.0  ;;  %v3926_v37 = vmul.f32 0.01, %v5330_v20 }
 0x2fa   :  { %v5327_v38 = vadd.f32 %v3396_v32, %v1181_v0  ;;  %v5331_v39 = vadd.f32 %v3568_v33, %v1189_v19  ;;  %v3398_v40 = vpop.f32.mrb[11].mxu0  ;;  %v3570_v41 = vpop.f32.mrb[11].mxu1  ;;  %v3937_v43 = vsel %vm3909_vm15, %v5325_v27, %v3923_v35  ;;  %v6535_v44 = vsel %vm3911_vm1, %v5329_v4, %v3925_v22  ;;  %v6055_v0 = vld [vmem:[#allocation11 + $0xa0] sm:$0xff]   ;;  %v6056_v19 = vld [vmem:[#allocation11 + $0xe8] sm:$0xff]   ;;  %v6059_v52 = vld [vmem:[#allocation11 + $0xb0] sm:$0xff]  }
 0x2fb   :  { %v5328_v45 = vadd.f32 %v3398_v40, %v1185_v63  ;;  %v5332_v47 = vadd.f32 %v3570_v41, %v1193_v23  ;;  %3715 = vmatpush1.bf16.msra.mxu0 %v6038_v34  ;;  %v3938_v57 = vsel %vm3910_vm2, %v5326_v31, %v3924_v36  ;;  %v3940_v58 = vsel %vm3912_vm3, %v5330_v20, %v3926_v37  ;;  %v6067_v63 = vld [vmem:[#allocation11 + $0x1a8] sm:$0xff]   ;;  %v6060_v31 = vld [vmem:[#allocation11 + $0xf8] sm:$0xff]   ;;  %v6070_v34 = vld [vmem:[#allocation11 + $0x140] sm:$0xff]  }
 0x2fc   :  { %vm3916_vm4 = vcmp.gt.f32.partialorder %v5327_v38, 0.0  ;;  %v3930_v49 = vmul.f32 0.01, %v5327_v38  ;;  %vm3918_vm5 = vcmp.gt.f32.partialorder %v5331_v39, 0.0  ;;  %v3932_v51 = vmul.f32 0.01, %v5331_v39  ;;  %3716 = vmatprep.subr.bf16.mxu0 %v6045_v6 }
 0x2fd   :  { %vm3917_vm6 = vcmp.gt.f32.partialorder %v5328_v45, 0.0  ;;  %v3931_v53 = vmul.f32 0.01, %v5328_v45  ;;  %vm3919_vm7 = vcmp.gt.f32.partialorder %v5332_v47, 0.0  ;;  %v3933_v54 = vmul.f32 0.01, %v5332_v47 }
 0x2fe   :  { %v3944_v55 = vsel %vm3916_vm4, %v5327_v38, %v3930_v49  ;;  %v6537_v56 = vsel %vm3918_vm5, %v5331_v39, %v3932_v51  ;;  %v6057_v23 = vld [vmem:[#allocation11 + $0xa8] sm:$0xff]   ;;  %v6069_v32 = vld [vmem:[#allocation11 + $0x1b8] sm:$0xff]   ;;  %v6071_v6 = vld [vmem:[#allocation11 + $0x100] sm:$0xff]   ;;  %v1205_v41 = vrot.slane %v6521_v18, %v212_v42 }
 0x2ff   :  { %v3951_v60 = vpack.c.bf16 %v3944_v55, %v3937_v43  ;;  %v3953_v61 = vpack.c.bf16 %v6537_v56, %v6535_v44  ;;  %3717 = vmatpush1.bf16.msra.mxu0 %v6043_v48  ;;  %v3945_v62 = vsel %vm3917_vm6, %v5328_v45, %v3931_v53  ;;  %v3947_v1 = vsel %vm3919_vm7, %v5332_v47, %v3933_v54  ;;  %v6061_v33 = vld [vmem:[#allocation11 + $0xb8] sm:$0xff]   ;;  %v6072_v35 = vld [vmem:[#allocation11 + $0x148] sm:$0xff]   ;;  %v6074_v36 = vld [vmem:[#allocation11 + $0x150] sm:$0xff]  }
 0x300   :  { %v3952_v30 = vpack.c.bf16 %v3945_v62, %v3938_v57  ;;  %v3954_v8 = vpack.c.bf16 %v3947_v1, %v3940_v58  ;;  %5305 = vmatprep.subr.bf16.mxu0 %v6286_v46  ;;  %v6073_v22 = vld [vmem:[#allocation11 + $0x108] sm:$0xff]   ;;  %v6075_v37 = vld [vmem:[#allocation11 + $0x110] sm:$0xff]   ;;  %v6076_v38 = vld [vmem:[#allocation11 + $0x158] sm:$0xff]  }
 0x301   :  { %v6078_v39 = vld [vmem:[#allocation11 + $0x160] sm:$0xff]   ;;  %v6080_v57 = vld [vmem:[#allocation11 + $0x168] sm:$0xff]  }
 0x302   :  { %4445 = vmatprep.mubr.bf16.mxu1 %v3952_v30  ;;  %3735 = vmatmul.mubr.bf16.vlgmr.msra.gmra.mrb[12].mxu0 %v6485_v21  ;;  %v6052_v21 = vld [vmem:[#allocation11 + $0xd8] sm:$0xff]   ;;  %v6079_v40 = vld [vmem:[#allocation11 + $0x120] sm:$0xff]   ;;  %v6082_v30 = vld [vmem:[#allocation11 + $0x170] sm:$0xff]  }
 0x303   :  { %4446 = vmatmul.mubr.bf16.vlgmr.msra.gmra.mrb[28].mxu1 %v3951_v60  ;;  %5306 = vmatpush3.bf16.msra.mxu0 %v6062_v2  ;;  %v6081_v60 = vld [vmem:[#allocation11 + $0x128] sm:$0xff]  }
 0x304   :  { %5213 = vmatpush3.bf16.msra.mxu1 %v6047_v7  ;;  %4486 = vmatprep.mubr.bf16.mxu1 %v3954_v8  ;;  %v6083_v7 = vld [vmem:[#allocation11 + $0x130] sm:$0xff]  }
 0x305   :  { %5214 = vmatprep.subr.bf16.mxu1 %v6048_v5  ;;  %5307 = vmatprep.subr.bf16.mxu0 %v6286_v46  ;;  %v6084_v5 = vld [vmem:[#allocation11 + $0x178] sm:$0xff]  }
 0x306   :  { %5321 = vmatprep.mubr.msk.bf16.mxu0 %vm6287_vm0, %v6286_v46 }
 0x307   :  { %5308 = vmatpush3.bf16.msra.mxu0 %v6063_v9  ;;  %v6085_v9 = vld [vmem:[#allocation11 + $0x138] sm:$0xff]  }
 0x308   :  { %5215 = vmatpush3.bf16.msra.mxu1 %v6049_v11  ;;  %5309 = vmatprep.subr.bf16.mxu0 %v6286_v46 }
 0x309   :  { %5216 = vmatprep.subr.bf16.mxu1 %v6050_v13 }
 0x30b   :  { %5310 = vmatpush3.bf16.msra.mxu0 %v6064_v14 }
 0x30c   :  { %5217 = vmatpush3.bf16.msra.mxu1 %v6051_v15  ;;  %5311 = vmatprep.subr.bf16.mxu0 %v6286_v46 }
 0x30d   :  { %5218 = vmatprep.subr.bf16.mxu1 %v6052_v21 }
 0x30f   :  { %5312 = vmatpush3.bf16.msra.mxu0 %v6065_v16 }
 0x310   :  { %5219 = vmatpush3.bf16.msra.mxu1 %v6053_v28  ;;  %5313 = vmatprep.subr.bf16.mxu0 %v6286_v46 }
 0x311   :  { %5220 = vmatprep.subr.bf16.mxu1 %v6054_v17 }
 0x313   :  { %5314 = vmatpush3.bf16.msra.mxu0 %v6066_v50 }
 0x314   :  { %5221 = vmatpush3.bf16.msra.mxu1 %v6055_v0  ;;  %5315 = vmatprep.subr.bf16.mxu0 %v6286_v46 }
 0x315   :  { %5222 = vmatprep.subr.bf16.mxu1 %v6056_v19 }
 0x316   :  { %v5131_v25 = vpop.f32.mrb[12].mxu1 }
 0x317   :  { %v5132_v59 = vpop.f32.mrb[13].mxu1  ;;  %5316 = vmatpush3.bf16.msra.mxu0 %v6067_v63  ;;  %v1197_v63 = vrot.slane %v6521_v18, %v204_v10 }
 0x318   :  { %5223 = vmatpush3.bf16.msra.mxu1 %v6057_v23  ;;  %v5133_v27 = vadd.f32 %v5132_v59, %v5131_v25  ;;  %v5134_v4 = vpop.f32.mrb[14].mxu1  ;;  %5317 = vmatprep.subr.bf16.mxu0 %v6286_v46  ;;  %v1201_v23 = vrot.slane %v6521_v18, %v208_v12 }
 0x319   :  { %v5135_v29 = vpop.f32.mrb[15].mxu1  ;;  %5224 = vmatprep.subr.bf16.mxu1 %v6058_v24 }
 0x31a   :  { %v5136_v20 = vadd.f32 %v5135_v29, %v5134_v4  ;;  %v3780_v45 = vadd.f32 %v5133_v27, %v1205_v41 }
 0x31b   :  { %5318 = vmatpush3.bf16.msra.mxu0 %v6068_v26 }
 0x31c   :  { %5225 = vmatpush3.bf16.msra.mxu1 %v6059_v52  ;;  %5319 = vmatprep.subr.bf16.mxu0 %v6286_v46  ;;  %v6077_v46 = vld [vmem:[#allocation11 + $0x118] sm:$0xff]   ;;  %v3783_v51 = vadd.f32 %v5136_v20, %v1205_v41 }
 0x31d   :  { %5226 = vmatprep.subr.bf16.mxu1 %v6060_v31 }
 0x31f   :  { %5320 = vmatpush3.bf16.msra.mxu0 %v6069_v32 }
 0x320   :  { %5227 = vmatpush3.bf16.msra.mxu1 %v6061_v33 }
 0x321   :  { %5234 = vmatprep.subr.bf16.mxu1 %v6070_v34 }
 0x323   :  { %4487 = vmatmul.mubr.bf16.vlgmr.msra.gmra.mrb[32].mxu1 %v3953_v61 }
 0x324   :  { %5235 = vmatpush3.bf16.msra.mxu1 %v6071_v6 }
 0x325   :  { %5236 = vmatprep.subr.bf16.mxu1 %v6072_v35 }
 0x328   :  { %5237 = vmatpush3.bf16.msra.mxu1 %v6073_v22 }
 0x329   :  { %5238 = vmatprep.subr.bf16.mxu1 %v6074_v36 }
 0x32c   :  { %5239 = vmatpush3.bf16.msra.mxu1 %v6075_v37 }
 0x32d   :  { %5240 = vmatprep.subr.bf16.mxu1 %v6076_v38 }
 0x330   :  { %5241 = vmatpush3.bf16.msra.mxu1 %v6077_v46 }
 0x331   :  { %5242 = vmatprep.subr.bf16.mxu1 %v6078_v39  ;;  %v5049_v39 = vld [vmem:[#allocation13] ss:$0 sm:$0xff] }
 0x334   :  { %5243 = vmatpush3.bf16.msra.mxu1 %v6079_v40 }
 0x335   :  { %5244 = vmatprep.subr.bf16.mxu1 %v6080_v57 }
 0x336   :  { %v5153_v43 = vpop.f32.mrb[16].mxu1 }
 0x337   :  { %v5154_v44 = vpop.f32.mrb[17].mxu1 }
 0x338   :  { %v5155_v47 = vadd.f32 %v5154_v44, %v5153_v43  ;;  %v5156_v48 = vpop.f32.mrb[18].mxu1  ;;  %5245 = vmatpush3.bf16.msra.mxu1 %v6081_v60 }
 0x339   :  { %v5157_v49 = vpop.f32.mrb[19].mxu1  ;;  %5246 = vmatprep.subr.bf16.mxu1 %v6082_v30 }
 0x33a   :  { %v3821_v53 = vadd.f32 %v5155_v47, %v3780_v45  ;;  %v5158_v54 = vadd.f32 %v5157_v49, %v5156_v48 }
 0x33c   :  { %v3824_v55 = vadd.f32 %v5158_v54, %v3783_v51  ;;  %5247 = vmatpush3.bf16.msra.mxu1 %v6083_v7 }
 0x33d   :  { %5248 = vmatprep.subr.bf16.mxu1 %v6084_v5 }
 0x340   :  { %5249 = vmatpush3.bf16.msra.mxu1 %v6085_v9 }
 0x356   :  { %v5175_v56 = vpop.f32.mrb[20].mxu1 }
 0x357   :  { %v5176_v58 = vpop.f32.mrb[21].mxu1 }
 0x358   :  { %v5177_v61 = vadd.f32 %v5176_v58, %v5175_v56  ;;  %v5178_v62 = vpop.f32.mrb[22].mxu1 }
 0x359   :  { %v5179_v1 = vpop.f32.mrb[23].mxu1 }
 0x35a   :  { %v5180_v42 = vadd.f32 %v5179_v1, %v5178_v62  ;;  %v3862_v2 = vadd.f32 %v5177_v61, %v3821_v53 }
 0x35c   :  { %v3865_v8 = vadd.f32 %v5180_v42, %v3824_v55 }
 0x376   :  { %v3902_v11 = vpop.f32.mrb[24].mxu1 }
 0x377   :  { %v3903_v13 = vadd.f32 %v3902_v11, %v3862_v2  ;;  %v5303_v14 = vpop.f32.mrb[25].mxu1 }
 0x378   :  { %v3905_v15 = vpop.f32.mrb[26].mxu1 }
 0x379   :  { %v3929_v21 = vmul.f32 0.01, %v3903_v13  ;;  %v3906_v16 = vadd.f32 %v3905_v15, %v3865_v8  ;;  %v5304_v28 = vpop.f32.mrb[27].mxu1  ;;  %vm3915_vm0 = vcmp.gt.f32.partialorder %v3903_v13, 0.0 }
 0x37b   :  { %vm3922_vm8 = vcmp.gt.f32.partialorder %v3906_v16, 0.0  ;;  %v3936_v17 = vmul.f32 0.01, %v3906_v16  ;;  %v3943_v50 = vsel %vm3915_vm0, %v3903_v13, %v3929_v21 }
 0x37d   :  { %v3950_v0 = vsel %vm3922_vm8, %v3906_v16, %v3936_v17 }
 0x37e   :  { %v3957_v19 = vpack.c.bf16 %v3950_v0, %v3943_v50 }
 0x380   :  { %5322 = vmatmul.mubr.bf16.vlgmr.msra.gmra.mrb[16].mxu0 %v3957_v19 }
 0x3d5   :  { %v3736_v24 = vpop.f32.mrb[12].mxu0 }
 0x3d6   :  { %v5206_v25 = vpop.f32.mrb[28].mxu1  ;;  %v5333_v59 = vadd.f32 %v3736_v24, %v1197_v63  ;;  %v3738_v26 = vpop.f32.mrb[13].mxu0 }
 0x3d7   :  { %v5207_v27 = vpop.f32.mrb[29].mxu1  ;;  %v5334_v4 = vadd.f32 %v3738_v26, %v1201_v23  ;;  %v3740_v52 = vpop.f32.mrb[14].mxu0 }
 0x3d8   :  { %v3927_v29 = vmul.f32 0.01, %v5333_v59  ;;  %v5208_v31 = vadd.f32 %v5207_v27, %v5206_v25  ;;  %v5209_v20 = vpop.f32.mrb[30].mxu1  ;;  %v5335_v32 = vadd.f32 %v3740_v52, %v1197_v63  ;;  %v3742_v33 = vpop.f32.mrb[15].mxu0  ;;  %vm3913_vm9 = vcmp.gt.f32.partialorder %v5333_v59, 0.0 }
 0x3d9   :  { %v3928_v34 = vmul.f32 0.01, %v5334_v4  ;;  %v5210_v6 = vpop.f32.mrb[31].mxu1  ;;  %v5336_v10 = vadd.f32 %v3742_v33, %v1201_v23  ;;  %vm3914_vm10 = vcmp.gt.f32.partialorder %v5334_v4, 0.0 }
 0x3da   :  { %vm3920_vm11 = vcmp.gt.f32.partialorder %v5335_v32, 0.0  ;;  %v3934_v3 = vmul.f32 0.01, %v5335_v32  ;;  %v5211_v12 = vadd.f32 %v5210_v6, %v5209_v20  ;;  %v3941_v35 = vsel %vm3913_vm9, %v5333_v59, %v3927_v29 }
 0x3db   :  { %vm3921_vm12 = vcmp.gt.f32.partialorder %v5336_v10, 0.0  ;;  %v3935_v18 = vmul.f32 0.01, %v5336_v10  ;;  %v3942_v37 = vsel %vm3914_vm10, %v5334_v4, %v3928_v34  ;;  %v4448_v43 = vadd.f32 %v5208_v31, %v5049_v39 }
 0x3dc   :  { %v3948_v22 = vsel %vm3920_vm11, %v5335_v32, %v3934_v3  ;;  %v4451_v48 = vadd.f32 %v5211_v12, %v5049_v39 }
 0x3dd   :  { %v3955_v36 = vpack.c.bf16 %v3948_v22, %v3941_v35  ;;  %v3949_v38 = vsel %vm3921_vm12, %v5336_v10, %v3935_v18 }
 0x3de   :  { %v3956_v46 = vpack.c.bf16 %v3949_v38, %v3942_v37 }
 0x3e0   :  { %4527 = vmatprep.mubr.bf16.mxu1 %v3956_v46 }
 0x3e1   :  { %4528 = vmatmul.mubr.bf16.vlgmr.msra.gmra.mrb[36].mxu1 %v3955_v36 }
 0x3f6   :  { %v5228_v40 = vpop.f32.mrb[32].mxu1 }
 0x3f7   :  { %v5229_v41 = vpop.f32.mrb[33].mxu1 }
 0x3f8   :  { %v5230_v44 = vadd.f32 %v5229_v41, %v5228_v40  ;;  %v5231_v45 = vpop.f32.mrb[34].mxu1 }
 0x3f9   :  { %v5232_v47 = vpop.f32.mrb[35].mxu1 }
 0x3fa   :  { %v4489_v49 = vadd.f32 %v5230_v44, %v4448_v43  ;;  %v5233_v51 = vadd.f32 %v5232_v47, %v5231_v45 }
 0x3fc   :  { %v4492_v53 = vadd.f32 %v5233_v51, %v4451_v48 }
 0x453   :  { %v4570_v54 = vpop.f32.mrb[16].mxu0 }
 0x454   :  { %v5323_v55 = vpop.f32.mrb[17].mxu0 }
 0x455   :  { %v4573_v56 = vpop.f32.mrb[18].mxu0 }
 0x456   :  { %v5324_v57 = vpop.f32.mrb[19].mxu0 }
 0x4b4   :  { %v5250_v58 = vpop.f32.mrb[36].mxu1 }
 0x4b5   :  { %v5251_v60 = vpop.f32.mrb[37].mxu1 }
 0x4b6   :  { %v5252_v61 = vadd.f32 %v5251_v60, %v5250_v58  ;;  %v5253_v62 = vpop.f32.mrb[38].mxu1 }
 0x4b7   :  { %v5254_v1 = vpop.f32.mrb[39].mxu1 }
 0x4b8   :  { %v4530_v42 = vadd.f32 %v5252_v61, %v4489_v49  ;;  %v5255_v2 = vadd.f32 %v5254_v1, %v5253_v62 }
 0x4ba   :  { %v4571_v30 = vadd.f32 %v4570_v54, %v4530_v42  ;;  %v4533_v7 = vadd.f32 %v5255_v2, %v4492_v53 }
 0x4bc   :  { %v4577_v8 = vmax.f32 %v4571_v30, 0.0  ;;  %v4574_v5 = vadd.f32 %v4573_v56, %v4533_v7 }
 0x4be   :  { %4579 = vst [vmem:[#allocation14] sm:$0xff] %v4577_v8  ;;  %v4578_v9 = vmax.f32 %v4574_v5, 0.0 }
 0x4c0   :  { %4580 = vst [vmem:[#allocation14 + $0x8] sm:$0xff] %v4578_v9 }
 0x4c1   :  { %6251 = shalt.err (!%p6248_p4)
}
 0x4c2   :  { %s6252_s20 = scalar_lea.hbm %s6588_s7, 256 }
 0x4c3   :  { %p6253_p5 = scmp.ne.s32.totalorder %s6588_s7, %s6252_s20  ;;  %p6256_p6 = scmp.lt.u32.totalorder %s6252_s20, %s6588_s7 }
 0x4c5   :  { %p6258_p7 = pnand %p6256_p6, %p6253_p5 }
 0x4c7   :  { %6261 = shalt.err (!%p6258_p7)
}
 0x4c8   :  { %4592 = dma.vmem_to_hbm [thread:$0]  %s4587_s15, 256, %s6588_s7, [#allocation4], %s6280_s5, %s6280_s5, %s6281_s18  }
 0x4c9   :  { %6270 = dma.done.wait [#allocation4], 256  }
 0x4ca   :  { %6271 = vsyncadd [#allocation4], 4294967040 }
 0x4cb   :  { %4596 = vsyncpa [#allocation3], 1 }
 0x4cc   :  { %4597 = vsyncpa [#allocation6], 1 }
 0x4cd   :  { %4598 = vsyncpa [#allocation9], 1 }
 0x4ce   :  { %4599 = vsyncpa [#allocation12], 1 }
 0x4cf   :  { %4600 = vsyncpa [#allocation4], 1 }

</bundles_post_ra>
